<compile_context>
chip_gen: v5e
topology: v5e:2x2
jax: 0.10.0
libtpu: 0.0.40
codegen_flags: <defaults>
</compile_context>

<pallas_src>
import functools
import math

import jax
import jax.numpy as jnp
from jax.experimental import pallas as pl
from jax.experimental.pallas import tpu as pltpu

BN_EPS = 1e-5
L2_EPS = 1e-12
LEAKY_SLOPE = 0.2


def _round_up(x, m):
    return (x + m - 1) // m * m


# ---------------------------------------------------------------------------
# Kernel: grid = (row tiles, K tiles).  K (the adj@emb reduction) is the last,
# "arbitrary" grid axis; the row axis is "parallel" (megacore sharding).
# ---------------------------------------------------------------------------
def ngcf_layer_kernel(
    adj_ref,    # (TR, TK)           bf16  adjacency tile
    embk_ref,   # (TK, D) / (Np, D)  bf16  emb for message passing (slab or resident)
    embr_ref,   # (TR, D)            f32   emb row tile (elementwise path)
    w_ref,      # (2D, D)            bf16  [W^T ; W_self^T] stacked, zero padded
    vec_ref,    # (8, D)             f32   rows: wb+wsb, wa_e, wa_s, scale, shift, attn_b, 0, 0
    out_ref,    # (TR, D)            f32   side accumulator, then layer output
    outb_ref,   # (TR, D)            bf16  bf16 copy of layer output (next layer's embk)
    *, tk, emb_resident,
):
    k = pl.program_id(1)

    @pl.when(k == 0)
    def _():
        out_ref[...] = jnp.zeros_like(out_ref)

    if emb_resident:
        start = pl.multiple_of(k * tk, tk)
        slab = embk_ref[pl.ds(start, tk), :]     # slice the VMEM-resident block
    else:
        slab = embk_ref[...]                     # streamed (tk, D) slab

    # message passing: side += adj_tile @ emb_slab (bf16 in, f32 accumulate in out_ref)
    out_ref[...] += jnp.dot(adj_ref[...], slab, preferred_element_type=jnp.float32)

    @pl.when(k == pl.num_programs(1) - 1)
    def _():
        side = out_ref[...]
        emb = embr_ref[...]
        vecs = vec_ref[...]
        bias = vecs[0:1, :]                      # wb + wsb
        wa_e, wa_s = vecs[1:2, :], vecs[2:3, :]
        scale, shift = vecs[3:4, :], vecs[4:5, :]
        ab = vecs[5:6, 0:1]

        # attention gate: sigmoid(Linear([emb, side])) with one fused row reduce
        logit = jnp.sum(emb * wa_e + side * wa_s, axis=1, keepdims=True) + ab
        attn = jax.nn.sigmoid(logit)             # (TR, 1)

        # fused epilogue matmul: [attn*side, emb*side] @ [W^T ; Wself^T]  (bf16, K=2D)
        lhs = jnp.concatenate([attn * side, emb * side], axis=1).astype(jnp.bfloat16)
        x = jnp.dot(lhs, w_ref[...], preferred_element_type=jnp.float32) + bias
        x = jnp.where(x >= 0, x, LEAKY_SLOPE * x)          # LeakyReLU(0.2)
        x = x * scale + shift                              # folded eval-mode BatchNorm
        # Dropout -> identity (eval mode)

        # F.normalize(p=2, dim=1): x * rsqrt(max(||x||^2, eps^2))  (EUP slot)
        nsq = jnp.sum(x * x, axis=1, keepdims=True)
        x = x * jax.lax.rsqrt(jnp.maximum(nsq, L2_EPS * L2_EPS))
        out_ref[...] = x
        outb_ref[...] = x.astype(outb_ref.dtype)


@functools.partial(jax.jit, static_argnames=("tr", "tk", "emb_resident"))
def ngcf_layer(adj_bf16, emb_f32, emb_bf16, layer_params, *, tr, tk, emb_resident):
    """One NGCF propagation layer on padded (N_pad, *) inputs. Returns (f32, bf16) new emb."""
    N_pad, D_pad = emb_f32.shape
    (w_t, wb, ws_t, wsb, wa_e, wa_s, ab, gamma, beta, rm, rv) = layer_params
    D = w_t.shape[0]
    pad_d = D_pad - D

    # Fold eval-mode BatchNorm into scale/shift; pack all per-dim vectors into one (8, D_pad) block.
    scale = gamma * jax.lax.rsqrt(rv + BN_EPS)
    shift = beta - rm * scale
    row = lambda v: jnp.pad(v.reshape(1, D), ((0, 0), (0, pad_d)))
    vec = jnp.concatenate([
        row(wb + wsb), row(wa_e.reshape(1, D)), row(wa_s.reshape(1, D)),
        row(scale), row(shift),
        jnp.full((1, D_pad), ab[0, 0], jnp.float32),
        jnp.zeros((2, D_pad), jnp.float32),
    ], axis=0)

    # Stack [W^T ; W_self^T] into one (2*D_pad, D_pad) bf16 weight (zero padded).
    w_stack = jnp.zeros((2 * D_pad, D_pad), jnp.float32)
    w_stack = w_stack.at[:D, :D].set(w_t)
    w_stack = w_stack.at[D_pad:D_pad + D, :D].set(ws_t)
    w_stack = w_stack.astype(jnp.bfloat16)

    rows_i = lambda i, k: (i, 0)
    full = lambda i, k: (0, 0)
    if emb_resident:
        embk_spec = pl.BlockSpec((N_pad, D_pad), full)      # one DMA, stays in VMEM
    else:
        embk_spec = pl.BlockSpec((tk, D_pad), lambda i, k: (k, 0))

    kernel = functools.partial(ngcf_layer_kernel, tk=tk, emb_resident=emb_resident)
    return pl.pallas_call(
        kernel,
        out_shape=(jax.ShapeDtypeStruct((N_pad, D_pad), jnp.float32),
                   jax.ShapeDtypeStruct((N_pad, D_pad), jnp.bfloat16)),
        grid_spec=pltpu.PrefetchScalarGridSpec(
            num_scalar_prefetch=0,
            grid=(N_pad // tr, N_pad // tk),
            in_specs=[
                pl.BlockSpec((tr, tk), lambda i, k: (i, k)),   # adj tile (bf16)
                embk_spec,                                     # emb for message passing (bf16)
                pl.BlockSpec((tr, D_pad), rows_i),             # emb row tile (f32)
                pl.BlockSpec((2 * D_pad, D_pad), full),        # [W^T ; W_self^T] (bf16)
                pl.BlockSpec((8, D_pad), full),                # packed per-dim vectors
            ],
            out_specs=(pl.BlockSpec((tr, D_pad), rows_i),
                       pl.BlockSpec((tr, D_pad), rows_i)),
        ),
        compiler_params=pltpu.CompilerParams(
            dimension_semantics=("parallel", "arbitrary")),
    )(adj_bf16, emb_bf16, emb_f32, w_stack, vec)


def ngcf_forward(adj, user_emb, item_emb, params, tr=1024, tk=1024, emb_resident=None):
    """Full EnhancedNGCF.forward: returns (user_embs, item_embs)."""
    assert tr % 128 == 0 and tk % 128 == 0, "tiles must be multiples of 128"
    num_users = user_emb.shape[0]
    emb = jnp.concatenate([user_emb, item_emb], axis=0)
    N, D = emb.shape

    D_pad = _round_up(D, 128)                  # lane-dense output stores
    N_128 = _round_up(N, 128)
    tr_eff = min(tr, N_128)                    # clamp tiles to the padded problem
    tk_eff = min(tk, N_128)
    lcm = tr_eff * tk_eff // math.gcd(tr_eff, tk_eff)
    N_pad = _round_up(N, lcm)
    assert N_pad % tr_eff == 0 and N_pad % tk_eff == 0

    if emb_resident is None:
        # Resident bf16 emb block is double-buffered by the pipeliner; keep it
        # (plus ~8 MiB of adj/out tiles) under the 32 MiB default scoped VMEM
        # limit shared by v5e/v6e/v7x.
        emb_resident = 2 * N_pad * D_pad * 2 <= 16 * 1024 * 1024

    adj_p = jnp.pad(adj, ((0, N_pad - N), (0, N_pad - N))).astype(jnp.bfloat16)
    emb_f = jnp.pad(emb, ((0, N_pad - N), (0, D_pad - D)))
    emb_b = emb_f.astype(jnp.bfloat16)

    all_embs = [emb]
    for layer_params in params:
        # Padded rows never pollute real rows (their adj columns are zero) and
        # padded columns stay exactly zero, so padded emb can be fed straight back.
        emb_f, emb_b = ngcf_layer(adj_p, emb_f, emb_b, layer_params,
                                  tr=tr_eff, tk=tk_eff, emb_resident=emb_resident)
        all_embs.append(emb_f[:N, :D])
    final = jnp.concatenate(all_embs, axis=1)
    return final[:num_users], final[num_users:]


# ---------------------------------------------------------------------------
# Pure-JAX reference (for correctness check)
# ---------------------------------------------------------------------------
def ngcf_layer_ref(adj, emb, layer_params):
    (w_t, wb, ws_t, wsb, wa_e, wa_s, ab, gamma, beta, rm, rv) = layer_params
    side = adj @ emb
    logit = emb @ wa_e + side @ wa_s + ab[0, 0]
    attn = jax.nn.sigmoid(logit)
    sum_embed = (attn * side) @ w_t + wb
    bi_embed = (emb * side) @ ws_t + wsb
    x = sum_embed + bi_embed
    x = jnp.where(x >= 0, x, LEAKY_SLOPE * x)
    x = (x - rm) * jax.lax.rsqrt(rv + BN_EPS) * gamma + beta
    norm = jnp.sqrt(jnp.sum(x * x, axis=1, keepdims=True))
    return x / jnp.maximum(norm, L2_EPS)


def ngcf_forward_ref(adj, user_emb, item_emb, params):
    num_users = user_emb.shape[0]
    emb = jnp.concatenate([user_emb, item_emb], axis=0)
    all_embs = [emb]
    for layer_params in params:
        emb = ngcf_layer_ref(adj, emb, layer_params)
        all_embs.append(emb)
    final = jnp.concatenate(all_embs, axis=1)
    return final[:num_users], final[num_users:]


# ---------------------------------------------------------------------------
# Deterministic parameter / input construction
# ---------------------------------------------------------------------------
def make_params(key, emb_dim, num_layers):
    params = []
    for _ in range(num_layers):
        key, k1, k2, k3, k4, k5, k6 = jax.random.split(key, 7)
        lim = (6.0 / (emb_dim + emb_dim)) ** 0.5
        w_t = jax.random.uniform(k1, (emb_dim, emb_dim), jnp.float32, -lim, lim)
        wb = jax.random.uniform(k2, (1, emb_dim), jnp.float32, -lim, lim)
        ws_t = jax.random.uniform(k3, (emb_dim, emb_dim), jnp.float32, -lim, lim)
        wsb = jax.random.uniform(k4, (1, emb_dim), jnp.float32, -lim, lim)
        lim_a = (6.0 / (2 * emb_dim + 1)) ** 0.5
        wa = jax.random.uniform(k5, (2 * emb_dim, 1), jnp.float32, -lim_a, lim_a)
        wa_e, wa_s = wa[:emb_dim], wa[emb_dim:]
        ab = jax.random.uniform(k6, (1, 1), jnp.float32, -lim_a, lim_a)
        # BatchNorm1d default init: gamma=1, beta=0, running_mean=0, running_var=1
        gamma = jnp.ones((1, emb_dim), jnp.float32)
        beta = jnp.zeros((1, emb_dim), jnp.float32)
        rm = jnp.zeros((1, emb_dim), jnp.float32)
        rv = jnp.ones((1, emb_dim), jnp.float32)
        params.append((w_t, wb, ws_t, wsb, wa_e, wa_s, ab, gamma, beta, rm, rv))
    return params


def make_adj(key, num_users, num_items):
    """Dense symmetric-normalized bipartite adjacency (the sparse adj, densified)."""
    R = (jax.random.uniform(key, (num_users, num_items)) < 0.3).astype(jnp.float32)
    N = num_users + num_items
    A = jnp.zeros((N, N), jnp.float32)
    A = A.at[:num_users, num_users:].set(R)
    A = A.at[num_users:, :num_users].set(R.T)
    deg = jnp.maximum(A.sum(axis=1), 1.0)
    d_inv_sqrt = 1.0 / jnp.sqrt(deg)
    return A * d_inv_sqrt[:, None] * d_inv_sqrt[None, :]


if __name__ == "__main__":
    num_users, num_items = 80, 80
    emb_dim, num_layers = 32, 3

    key = jax.random.PRNGKey(0)
    k_u, k_i, k_adj, k_p = jax.random.split(key, 4)

    lim_u = (6.0 / (num_users + emb_dim)) ** 0.5
    user_emb = jax.random.uniform(k_u, (num_users, emb_dim), jnp.float32, -lim_u, lim_u)
    lim_i = (6.0 / (num_items + emb_dim)) ** 0.5
    item_emb = jax.random.uniform(k_i, (num_items, emb_dim), jnp.float32, -lim_i, lim_i)

    adj = make_adj(k_adj, num_users, num_items)
    params = make_params(k_p, emb_dim, num_layers)
    user_ref, item_ref = ngcf_forward_ref(adj, user_emb, item_emb, params)

    # Small tiles so the test exercises both grid axes (N=160 -> N_pad=256,
    # grid=(2,2)) in both the VMEM-resident-emb and streamed-emb paths, plus the
    # tile-clamping path with the production defaults (tr=tk=1024 -> 256).
    configs = [
        dict(tr=128, tk=128),                        # resident emb (auto), grid (2,2)
        dict(tr=128, tk=128, emb_resident=False),    # streamed K-slabs, grid (2,2)
        dict(),                                      # defaults, clamped, grid (1,1)
    ]
    for cfg in configs:
        user_out, item_out = ngcf_forward(adj, user_emb, item_emb, params, **cfg)
        user_out = jax.block_until_ready(user_out)
        item_out = jax.block_until_ready(item_out)
        assert user_out.shape == (num_users, emb_dim * (num_layers + 1))
        assert item_out.shape == (num_items, emb_dim * (num_layers + 1))
        # bf16 message passing + bf16 epilogue matmuls -> 2e-2 tolerance vs f32 ref
        assert jnp.allclose(user_out, user_ref, atol=2e-2, rtol=2e-2), cfg
        assert jnp.allclose(item_out, item_ref, atol=2e-2, rtol=2e-2), cfg

    print("KERNEL_OK")
</pallas_src>

<mosaic_0001>
module attributes {stable_mosaic.version = 11 : i64} {
  func.func @ngcf_layer_kernel(%arg0: i32, %arg1: i32, %arg2: memref<128x128xbf16, #tpu.memory_space<vmem>>, %arg3: memref<256x128xbf16, #tpu.memory_space<vmem>>, %arg4: memref<128x128xf32, #tpu.memory_space<vmem>>, %arg5: memref<256x128xbf16, #tpu.memory_space<vmem>>, %arg6: memref<8x128xf32, #tpu.memory_space<vmem>>, %arg7: memref<128x128xf32, #tpu.memory_space<vmem>>, %arg8: memref<128x128xbf16, #tpu.memory_space<vmem>>) attributes {dimension_semantics = [#tpu.dimension_semantics<parallel>, #tpu.dimension_semantics<arbitrary>], iteration_bounds = array<i64: 2, 2>, scalar_prefetch = 0 : i64, scratch_operands = 0 : i64, tpu.core_type = #tpu.core_type<tc>, window_params = [{transform_indices = @transform_0, window_bounds = array<i64: 128, 128>}, {pipeline_mode = #tpu.pipeline_mode<synchronous>, transform_indices = @transform_1, window_bounds = array<i64: 256, 128>}, {transform_indices = @transform_2, window_bounds = array<i64: 128, 128>}, {pipeline_mode = #tpu.pipeline_mode<synchronous>, transform_indices = @transform_3, window_bounds = array<i64: 256, 128>}, {pipeline_mode = #tpu.pipeline_mode<synchronous>, transform_indices = @transform_4, window_bounds = array<i64: 8, 128>}, {transform_indices = @transform_5, window_bounds = array<i64: 128, 128>}, {transform_indices = @transform_6, window_bounds = array<i64: 128, 128>}]} {
    %c0_i32 = arith.constant 0 : i32
    %0 = arith.cmpi eq, %arg1, %c0_i32 : i32
    %1 = arith.extui %0 : i1 to i32
    %c0_i32_0 = arith.constant 0 : i32
    %2 = arith.cmpi ne, %1, %c0_i32_0 : i32
    scf.if %2 {
      %cst_8 = arith.constant 0.000000e+00 : f32
      %15 = vector.broadcast %cst_8 : f32 to vector<128x128xf32>
      %c0_9 = arith.constant 0 : index
      %c0_10 = arith.constant 0 : index
      %16 = vector.load %arg7[%c0_9, %c0_10] : memref<128x128xf32, #tpu.memory_space<vmem>>, vector<128x128xf32>
      tpu.vector_store %arg7[%c0_9, %c0_10], %15 {strides = array<i32>} : memref<128x128xf32, #tpu.memory_space<vmem>>, vector<128x128xf32>,
    } else {
    }
    %c128_i32 = arith.constant 128 : i32
    %3 = arith.muli %arg1, %c128_i32 : i32
    %4 = tpu.assume_multiple %3, 128 : i32
    %5 = arith.index_cast %4 : i32 to index
    %c0 = arith.constant 0 : index
    %6 = vector.load %arg3[%5, %c0] : memref<256x128xbf16, #tpu.memory_space<vmem>>, vector<128x128xbf16>
    %c0_1 = arith.constant 0 : index
    %c0_2 = arith.constant 0 : index
    %7 = vector.load %arg7[%c0_1, %c0_2] : memref<128x128xf32, #tpu.memory_space<vmem>>, vector<128x128xf32>
    %c0_3 = arith.constant 0 : index
    %c0_4 = arith.constant 0 : index
    %8 = vector.load %arg2[%c0_3, %c0_4] : memref<128x128xbf16, #tpu.memory_space<vmem>>, vector<128x128xbf16>
    %cst = arith.constant dense<0.000000e+00> : vector<128x128xf32>
    %9 = tpu.matmul %8, %6, %cst {dimension_numbers = #tpu.dot_dimension_numbers<[1], [0], [0], [1], [0, 0, 1, 1], [], []>} : vector<128x128xbf16>, vector<128x128xbf16>, vector<128x128xf32> -> vector<128x128xf32>
    %10 = arith.addf %7, %9 : vector<128x128xf32>
    %c0_5 = arith.constant 0 : index
    %c0_6 = arith.constant 0 : index
    %11 = vector.load %arg7[%c0_5, %c0_6] : memref<128x128xf32, #tpu.memory_space<vmem>>, vector<128x128xf32>
    tpu.vector_store %arg7[%c0_5, %c0_6], %10 {strides = array<i32>} : memref<128x128xf32, #tpu.memory_space<vmem>>, vector<128x128xf32>,
    %c1_i32 = arith.constant 1 : i32
    %12 = arith.cmpi eq, %arg1, %c1_i32 : i32
    %13 = arith.extui %12 : i1 to i32
    %c0_i32_7 = arith.constant 0 : i32
    %14 = arith.cmpi ne, %13, %c0_i32_7 : i32
    scf.if %14 {
      %c0_8 = arith.constant 0 : index
      %c0_9 = arith.constant 0 : index
      %15 = vector.load %arg7[%c0_8, %c0_9] : memref<128x128xf32, #tpu.memory_space<vmem>>, vector<128x128xf32>
      %c0_10 = arith.constant 0 : index
      %c0_11 = arith.constant 0 : index
      %16 = vector.load %arg4[%c0_10, %c0_11] : memref<128x128xf32, #tpu.memory_space<vmem>>, vector<128x128xf32>
      %c0_12 = arith.constant 0 : index
      %c0_13 = arith.constant 0 : index
      %17 = vector.load %arg6[%c0_12, %c0_13] : memref<8x128xf32, #tpu.memory_space<vmem>>, vector<8x128xf32>
      %18 = vector.extract_strided_slice %17 {offsets = [0, 0], sizes = [1, 128], strides = [1, 1]} : vector<8x128xf32> to vector<1x128xf32>
      %19 = vector.extract_strided_slice %17 {offsets = [1, 0], sizes = [1, 128], strides = [1, 1]} : vector<8x128xf32> to vector<1x128xf32>
      %20 = vector.extract_strided_slice %17 {offsets = [2, 0], sizes = [1, 128], strides = [1, 1]} : vector<8x128xf32> to vector<1x128xf32>
      %21 = vector.extract_strided_slice %17 {offsets = [3, 0], sizes = [1, 128], strides = [1, 1]} : vector<8x128xf32> to vector<1x128xf32>
      %22 = vector.extract_strided_slice %17 {offsets = [4, 0], sizes = [1, 128], strides = [1, 1]} : vector<8x128xf32> to vector<1x128xf32>
      %23 = vector.extract_strided_slice %17 {offsets = [5, 0], sizes = [1, 1], strides = [1, 1]} : vector<8x128xf32> to vector<1x1xf32>
      %24 = vector.broadcast %19 : vector<1x128xf32> to vector<128x128xf32>
      %25 = arith.mulf %16, %24 : vector<128x128xf32>
      %26 = vector.broadcast %20 : vector<1x128xf32> to vector<128x128xf32>
      %27 = arith.mulf %15, %26 : vector<128x128xf32>
      %28 = arith.addf %25, %27 : vector<128x128xf32>
      %cst_14 = arith.constant dense<0.000000e+00> : vector<128xf32>
      %29 = vector.multi_reduction <add>, %28, %cst_14 [1] : vector<128x128xf32> to vector<128xf32>
      %30 = vector.shape_cast %29 : vector<128xf32> to vector<128x1xf32>
      %31 = vector.broadcast %23 : vector<1x1xf32> to vector<128x1xf32>
      %32 = arith.addf %30, %31 : vector<128x1xf32>
      %33 = arith.negf %32 : vector<128x1xf32>
      %34 = math.exp %33 : vector<128x1xf32>
      %cst_15 = arith.constant 1.000000e+00 : f32
      %35 = vector.broadcast %cst_15 : f32 to vector<128x1xf32>
      %36 = arith.addf %35, %34 : vector<128x1xf32>
      %37 = arith.divf %35, %36 : vector<128x1xf32>
      %38 = vector.broadcast %37 : vector<128x1xf32> to vector<128x128xf32>
      %39 = arith.mulf %38, %15 : vector<128x128xf32>
      %40 = arith.mulf %16, %15 : vector<128x128xf32>
      %41 = tpu.concatenate %39, %40 in 1 : vector<128x128xf32>, vector<128x128xf32> -> vector<128x256xf32>
      %42 = arith.truncf %41 : vector<128x256xf32> to vector<128x256xbf16>
      %c0_16 = arith.constant 0 : index
      %c0_17 = arith.constant 0 : index
      %43 = vector.load %arg5[%c0_16, %c0_17] : memref<256x128xbf16, #tpu.memory_space<vmem>>, vector<256x128xbf16>
      %cst_18 = arith.constant dense<0.000000e+00> : vector<128x128xf32>
      %44 = tpu.matmul %42, %43, %cst_18 {dimension_numbers = #tpu.dot_dimension_numbers<[1], [0], [0], [1], [0, 0, 1, 1], [], []>} : vector<128x256xbf16>, vector<256x128xbf16>, vector<128x128xf32> -> vector<128x128xf32>
      %45 = vector.broadcast %18 : vector<1x128xf32> to vector<128x128xf32>
      %46 = arith.addf %44, %45 : vector<128x128xf32>
      %cst_19 = arith.constant 0.000000e+00 : f32
      %47 = vector.broadcast %cst_19 : f32 to vector<128x128xf32>
      %48 = arith.cmpf oge, %46, %47 : vector<128x128xf32>
      %cst_20 = arith.constant 2.000000e-01 : f32
      %49 = vector.broadcast %cst_20 : f32 to vector<128x128xf32>
      %50 = arith.mulf %49, %46 : vector<128x128xf32>
      %51 = arith.select %48, %46, %50 : vector<128x128xi1>, vector<128x128xf32>
      %52 = vector.broadcast %21 : vector<1x128xf32> to vector<128x128xf32>
      %53 = arith.mulf %51, %52 : vector<128x128xf32>
      %54 = vector.broadcast %22 : vector<1x128xf32> to vector<128x128xf32>
      %55 = arith.addf %53, %54 : vector<128x128xf32>
      %56 = arith.mulf %55, %55 : vector<128x128xf32>
      %cst_21 = arith.constant dense<0.000000e+00> : vector<128xf32>
      %57 = vector.multi_reduction <add>, %56, %cst_21 [1] : vector<128x128xf32> to vector<128xf32>
      %58 = vector.shape_cast %57 : vector<128xf32> to vector<128x1xf32>
      %cst_22 = arith.constant 1.000000e-24 : f32
      %59 = vector.broadcast %cst_22 : f32 to vector<128x1xf32>
      %60 = arith.maximumf %58, %59 : vector<128x1xf32>
      %61 = math.rsqrt %60 : vector<128x1xf32>
      %62 = vector.broadcast %61 : vector<128x1xf32> to vector<128x128xf32>
      %63 = arith.mulf %55, %62 : vector<128x128xf32>
      %c0_23 = arith.constant 0 : index
      %c0_24 = arith.constant 0 : index
      %64 = vector.load %arg7[%c0_23, %c0_24] : memref<128x128xf32, #tpu.memory_space<vmem>>, vector<128x128xf32>
      tpu.vector_store %arg7[%c0_23, %c0_24], %63 {strides = array<i32>} : memref<128x128xf32, #tpu.memory_space<vmem>>, vector<128x128xf32>,
      %65 = arith.truncf %63 : vector<128x128xf32> to vector<128x128xbf16>
      %c0_25 = arith.constant 0 : index
      %c0_26 = arith.constant 0 : index
      %66 = vector.load %arg8[%c0_25, %c0_26] : memref<128x128xbf16, #tpu.memory_space<vmem>>, vector<128x128xbf16>
      tpu.vector_store %arg8[%c0_25, %c0_26], %65 {strides = array<i32>} : memref<128x128xbf16, #tpu.memory_space<vmem>>, vector<128x128xbf16>,
    } else {
    }
    return
  }
  func.func @transform_0(%arg0: i32, %arg1: i32) -> (i32, i32) {
    %c0_i32 = arith.constant 0 : i32
    return %arg0, %arg1 : i32, i32
  }
  func.func @transform_1(%arg0: i32, %arg1: i32) -> (i32, i32) {
    %c0_i32 = arith.constant 0 : i32
    %c0_i32_0 = arith.constant 0 : i32
    %c0_i32_1 = arith.constant 0 : i32
    return %c0_i32, %c0_i32_0 : i32, i32
  }
  func.func @transform_2(%arg0: i32, %arg1: i32) -> (i32, i32) {
    %c0_i32 = arith.constant 0 : i32
    %c0_i32_0 = arith.constant 0 : i32
    return %arg0, %c0_i32 : i32, i32
  }
  func.func @transform_3(%arg0: i32, %arg1: i32) -> (i32, i32) {
    %c0_i32 = arith.constant 0 : i32
    %c0_i32_0 = arith.constant 0 : i32
    %c0_i32_1 = arith.constant 0 : i32
    return %c0_i32, %c0_i32_0 : i32, i32
  }
  func.func @transform_4(%arg0: i32, %arg1: i32) -> (i32, i32) {
    %c0_i32 = arith.constant 0 : i32
    %c0_i32_0 = arith.constant 0 : i32
    %c0_i32_1 = arith.constant 0 : i32
    return %c0_i32, %c0_i32_0 : i32, i32
  }
  func.func @transform_5(%arg0: i32, %arg1: i32) -> (i32, i32) {
    %c0_i32 = arith.constant 0 : i32
    %c0_i32_0 = arith.constant 0 : i32
    return %arg0, %c0_i32 : i32, i32
  }
  func.func @transform_6(%arg0: i32, %arg1: i32) -> (i32, i32) {
    %c0_i32 = arith.constant 0 : i32
    %c0_i32_0 = arith.constant 0 : i32
    return %arg0, %c0_i32 : i32, i32
  }
}

</mosaic_0001>

<bundles_post_ra>
// kernel: ngcf_layer.1
= control target key start
LH: loop header
LB: loop body
LE: loop exit
PB: predicated region body
PF: predicated region fallthrough
CT: control target
= control target key end

     0   :  { %s3880_s0 = inlined_call_operand.hbm [shape: bf16[256,256], index: 0, kind: input, shape index: {}]   ;;  %s3881_s1 = inlined_call_operand.vmem [shape: bf16[256,128], index: 1, kind: input, shape index: {}]   ;;  %s3882_s2 = inlined_call_operand.hbm [shape: f32[256,128], index: 2, kind: input, shape index: {}]   ;;  %s3883_s3 = inlined_call_operand.vmem [shape: bf16[256,128], index: 3, kind: input, shape index: {}]   ;;  %s3884_s4 = inlined_call_operand.vmem [shape: f32[8,128], index: 4, kind: input, shape index: {}]   ;;  %s3885_s5 = inlined_call_operand.hbm [shape: f32[256,128], index: 5, kind: output, shape index: {0}]   ;;  %s3886_s6 = inlined_call_operand.hbm [shape: bf16[256,128], index: 6, kind: output, shape index: {1}]  }
   0x1   :  { %3901 = sst [smem:[#allocation21_spill]] %s3880_s0 }
   0x2   :  { %3902 = sst [smem:[#allocation22_spill]] %s3881_s1 }
   0x3   :  { %3903 = sst [smem:[#allocation23_spill]] %s3882_s2 }
   0x4   :  { %3904 = sst [smem:[#allocation24_spill]] %s3883_s3 }
   0x5   :  { %3905 = sst [smem:[#allocation25_spill]] %s3884_s4 }
   0x6   :  { %3906 = sst [smem:[#allocation26_spill]] %s3885_s5 }
   0x7   :  { %3907 = sst [smem:[#allocation27_spill]] %s3886_s6 }
   0x8   :  { %12 = vsyncpa [#allocation3], 0 }
   0x9   :  { %14 = vsyncpa [#allocation3 + $0x1], 0 }
   0xa   :  { %15 = vsyncpa [#allocation6], 0 }
   0xb   :  { %17 = vsyncpa [#allocation6 + $0x1], 0 }
   0xc   :  { %18 = vsyncpa [#allocation4], 0 }
   0xd   :  { %20 = vsyncpa [#allocation4 + $0x1], 0 }
   0xe   :  { %21 = vsyncpa [#allocation9], 0 }
   0xf   :  { %23 = vsyncpa [#allocation9 + $0x1], 0  ;;  %s2732_s21 = smov 0   ;;  %s2734_s22 = smov 0  }
  0x10   :  { %s2736_s23 = smov 0   ;;  %s2738_s24 = smov 0  }
  0x11   :  { %s2740_s25 = smov 0   ;;  %s2742_s26 = smov 0  }
  0x12   :  { %s2744_s27 = smov 0   ;;  %s2746_s28 = smov 0  }
  0x13   :  { %s2748_s29 = smov 0   ;;  %s2750_s30 = smov 0  }
  0x14   :  { %s2752_s7 = smov 0  }
  0x15 LB: > { %3908 = sst [smem:[#allocation14_spill]] %s2673_s28  ;;  %s38_s8 = sadd.s32 1, %s2677_s29  ;;  %s2685_s7 = sphi %s2752_s7, %s29_s7   ;;  %s2681_s30 = sphi %s2750_s30, %s3972_s30   ;;  %s2677_s29 = sphi %s2748_s29, %s3971_s29   ;;  %s2673_s28 = sphi %s2746_s28, %s3970_s28   ;;  %s2669_s27 = sphi %s2744_s27, %s3969_s27   ;;  %s2665_s26 = sphi %s2742_s26, %s3978_s26   ;;  %s2661_s25 = sphi %s2740_s25, %s3977_s25   ;;  %s2657_s24 = sphi %s2738_s24, %s3976_s24   ;;  %s2653_s23 = sphi %s2736_s23, %s3975_s23   ;;  %s2649_s22 = sphi %s2734_s22, %s3974_s22   ;;  %s2645_s21 = sphi %s2732_s21, %s3973_s21  }
  0x16   : > { %3909 = sst [smem:[#allocation15_spill]] %s2677_s29  ;;  %s41_s9 = sadd.s32 1, %s2681_s30 }
  0x17   : > { %3910 = sst [smem:[#allocation16_spill]] %s2681_s30  ;;  %p39_p0 = scmp.ge.s32.totalorder %s38_s8, 2 }
  0x18   : > { %s50_s10 = sadd.s32 1, %s2665_s26  ;;  %p57_p1 = scmp.ne.s32.totalorder %s2665_s26, %s2661_s25 }
  0x19   : > { %p58_p2 = scmp.eq.s32.totalorder %s2685_s7, 0  ;;  %s3980_s8 = smov (%p39_p0, %s38_s8), 0 }
  0x1a   : > { %3911 = sst [smem:[#allocation17_spill]] %s3980_s8  ;;  %s3982_s9 = smov (!%p39_p0, %s41_s9), %s2681_s30 }
  0x1b   : > { %s46_s11 = ssub.s32 %s2677_s29, %s3980_s8  ;;  %p2800_p3 = por %p58_p2, %p57_p1 }
  0x1c   : > { %p43_p4 = scmp.ge.s32.totalorder %s3982_s9, 2  ;;  %p63_p5 = scmp.ne.s32.totalorder %s2661_s25, %s2657_s24 }
  0x1d   : > { %p2259_p6 = scmp.lt.s32.totalorder %s2685_s7, 4  ;;  %s237_s13 = sand.u32 1, %s2665_s26  }
  0x1e   : > { %s3984_s9 = smov (%p43_p4, %s3982_s9), 0  ;;  %s2114_s14 = sshll.u32 %s2681_s30, 5 }
  0x1f   : > { %3913 = sst [smem:[#allocation18_spill]] %s3984_s9  ;;  %s45_s15 = ssub.s32 %s2681_s30, %s3984_s9 }
  0x20   : > { %s47_s16 = sor.u32 %s46_s11, %s45_s15  ;;  %p95_p7 = scmp.eq.s32.totalorder %s45_s15, 0 }
  0x21   : > { %p48_p8 = scmp.eq.s32.totalorder %s47_s16, 0  ;;  %s1946_s17 = sshll.u32 %s237_s13, 6 }
  0x22   : > { %s246_s18 = sadd.s32 %s2677_s29, %s2114_s14  ;;  %s241_s8 = scalar_lea.vmem [#allocation2], %s1946_s17 }
  0x23   : > { %s2815_s19 = scalar_select %p48_p8, %s2665_s26, %s50_s10  }
  0x24   : > { %s1949_s20 = sshll.u32 %s246_s18, 2  ;;  %s251_s6 = sshll.u32 %s241_s8, 4  ;;  %s252_s6 = int_to_ptr.vmem [resolvable:$true] %s251_s6 }
  0x25   : > { %s3914_s0 = sld [smem:[#allocation21_spill]]  ;;  %p2246_p9 = pnand %p2259_p6, %p2800_p3 }
  0x26   : > { %p1953_p10 = scmp.ge.s32.totalorder %s2685_s7, 1  ;;  %s238_s8 = scalar_lea.sflag [#allocation3], %s237_s13 }
  0x27   : > { %s3892_s10 = smov 128   ;;  %s2688_s5 = smov 64  }
  0x28   : > { %s2689_s28 = smov 4   ;;  %p281_p11 = scmp.lt.s32.totalorder %s2685_s7, 5 }
  0x29   : > { %s1942_s12 = sadd.s32 4294967295, %s2685_s7   ;;  %s1943_s14 = sadd.s32 4294967294, %s2685_s7  }
  0x2a   : > { %p2827_p12 = pnand %p1953_p10, %p281_p11  ;;  %p64_p13 = scmp.eq.s32.totalorder %s1942_s12, 0 }
  0x2b   : > { %s248_s3 = scalar_lea.hbm %s3914_s0, %s1949_s20  ;;  %s97_s16 = sadd.s32 1, %s2653_s23 }
  0x2c   : > { %s249_s11 = sshll.u32 %s248_s3, 4  ;;  %p2841_p0 = por %p64_p13, %p63_p5  ;;  %s250_s11 = int_to_ptr.hbm [resolvable:$true] %s249_s11 }
  0x2d   : > { %2248 = dma.hbm_to_vmem [thread:$0]  (!%p2246_p9), %s250_s11, 1024, %s252_s6, %s238_s8, %s3892_s10, %s2688_s5, %s2689_s28  }
  0x2e   : > { %s2836_s17 = scalar_select %p95_p7, %s2653_s23, %s97_s16  }
  0x2f   : > { %p104_p1 = scmp.ne.s32.totalorder %s2653_s23, %s2649_s22  ;;  %p110_p3 = scmp.ne.s32.totalorder %s2649_s22, %s2645_s21 }
  0x30   : > { %p176_p4 = scmp.eq.s32.totalorder %s1942_s12, 3  ;;  %p182_p9 = scmp.eq.s32.totalorder %s1943_s14, 3 }
  0x31   : > { %p2851_p8 = por %p104_p1, %p58_p2  ;;  %p2855_p10 = por %p110_p3, %p64_p13 }
  0x32   : > { %p2859_p7 = por %p176_p4, %p104_p1  ;;  %p2863_p5 = por %p182_p9, %p110_p3 }
  0x33   : > { %s261_s20 = sand.u32 1, %s2653_s23   ;;  %s2115_s8 = sshll.u32 %s2681_s30, 7 }
  0x34   : > { %s1950_s11 = sshll.u32 %s261_s20, 7  ;;  %s3921_s2 = sld [smem:[#allocation23_spill]] }
  0x35   : > { %s265_s14 = scalar_lea.vmem [#allocation5], %s1950_s11  ;;  %p2249_p2 = pnand %p2259_p6, %p2851_p8 }
  0x36   : > { %s273_s16 = sshll.u32 %s265_s14, 4  ;;  %s262_s0 = scalar_lea.sflag [#allocation6], %s261_s20  ;;  %s274_s16 = int_to_ptr.vmem [resolvable:$true] %s273_s16 }
  0x37   : > { %s2690_s9 = smov 8   ;;  %s3922_s29 = smov 128  }
  0x38   : > { %285 = sbr.rel (%p2827_p12) target bundleno = 959 (0x3bf), region = 40  ;;  %s287_s5 = sand.u32 (!%p2827_p12), 1, %s2661_s25  }
  0x39   : > { %s288_s11 = scalar_lea.sflag (!%p2827_p12), [#allocation3], %s287_s5 }
  0x3a   : > { %s270_s12 = scalar_lea.hbm %s3921_s2, %s2115_s8  ;;  %s1954_s8 = sshll.u32 (!%p2827_p12), %s287_s5, 6 }
  0x3b   : > { %s271_s10 = sshll.u32 %s270_s12, 4  ;;  %s2881_s28 = scalar_lea.vmem (!%p2827_p12), [#allocation2], %s1954_s8  ;;  %s272_s10 = int_to_ptr.hbm [resolvable:$true] %s271_s10 }
  0x3c   : > { %2251 = dma.hbm_to_vmem [thread:$0]  (!%p2249_p2), %s272_s10, 2048, %s274_s16, %s262_s0, %s3922_s29, %s3922_s29, %s2690_s9  }
  0x3d   : > { %2628 = dma.done.wait (%p2841_p0), %s288_s11, 1024  }
  0x3e   : > { %2630 = vsyncadd (%p2841_p0), %s288_s11, 4294966272  ;;  %s2888_s6 = sand.u32 1, %s2649_s22  }
  0x3f   : > { %s1955_s0 = sshll.u32 %s2888_s6, 7  ;;  %s298_s29 = scalar_lea.sflag [#allocation6], %s2888_s6 }
  0x40   : > { %s2892_s9 = scalar_lea.vmem [#allocation5], %s1955_s0 }
  0x41   : > { %2632 = dma.done.wait (%p2855_p10), %s298_s29, 2048  }
  0x42   : > { %2634 = vsyncadd (%p2855_p10), %s298_s29, 4294965248  ;;  %s1957_s10 = sshll.u32 %s2888_s6, 6  ;;  %s2899_s3 = scalar_lea.vmem [#allocation7], %s1955_s0 }
  0x43   : > { %s2901_s13 = scalar_lea.vmem [#allocation8], %s1957_s10  ;;  %p1958_p6 = scmp.ne.s32.totalorder %s2669_s27, 0 }
  0x45   : > { %348 = sbr.rel (%p1958_p6) target bundleno = 91 (0x5b), region = 52 }
  0x4a   : > { %v2691_v0 = vmov 0.0  }
  0x4b   : > { %349 = vst [vmem:[%s2899_s3] sm:$0xff] %v2691_v0 }
  0x4c   : > { %350 = vst [vmem:[%s2899_s3 + $0x8] sm:$0xff] %v2691_v0 }
  0x4d   : > { %351 = vst [vmem:[%s2899_s3 + $0x10] sm:$0xff] %v2691_v0 }
  0x4e   : > { %352 = vst [vmem:[%s2899_s3 + $0x18] sm:$0xff] %v2691_v0 }
  0x4f   : > { %353 = vst [vmem:[%s2899_s3 + $0x20] sm:$0xff] %v2691_v0 }
  0x50   : > { %354 = vst [vmem:[%s2899_s3 + $0x28] sm:$0xff] %v2691_v0 }
  0x51   : > { %355 = vst [vmem:[%s2899_s3 + $0x30] sm:$0xff] %v2691_v0 }
  0x52   : > { %356 = vst [vmem:[%s2899_s3 + $0x38] sm:$0xff] %v2691_v0 }
  0x53   : > { %357 = vst [vmem:[%s2899_s3 + $0x40] sm:$0xff] %v2691_v0 }
  0x54   : > { %358 = vst [vmem:[%s2899_s3 + $0x48] sm:$0xff] %v2691_v0 }
  0x55   : > { %359 = vst [vmem:[%s2899_s3 + $0x50] sm:$0xff] %v2691_v0 }
  0x56   : > { %360 = vst [vmem:[%s2899_s3 + $0x58] sm:$0xff] %v2691_v0 }
  0x57   : > { %361 = vst [vmem:[%s2899_s3 + $0x60] sm:$0xff] %v2691_v0 }
  0x58   : > { %362 = vst [vmem:[%s2899_s3 + $0x68] sm:$0xff] %v2691_v0 }
  0x59   : > { %363 = vst [vmem:[%s2899_s3 + $0x70] sm:$0xff] %v2691_v0 }
  0x5a   : > { %364 = vst [vmem:[%s2899_s3 + $0x78] sm:$0xff] %v2691_v0 }
  0x5b PF: > { %s1959_s15 = sshll.u32 %s2669_s27, 7  ;;  %s3923_s1 = sld [smem:[#allocation22_spill]]  ;;  %v2124_v9 = vld [vmem:[%s2881_s28] sm:$0xff]  ;;  %v2126_v10 = vld [vmem:[%s2881_s28 + $0x10] sm:$0xff]  ;;  %v2125_v13 = vld [vmem:[%s2881_s28 + $0x8] sm:$0xff] }
  0x5c   : > { %s366_s20 = sshra.s32 %s1959_s15, 3  ;;  %v2128_v11 = vld [vmem:[%s2881_s28 + $0x20] sm:$0xff]  ;;  %v2130_v12 = vld [vmem:[%s2881_s28 + $0x30] sm:$0xff]  ;;  %v2127_v14 = vld [vmem:[%s2881_s28 + $0x18] sm:$0xff]  ;;  %p2025_p11 = scmp.ne.s32.totalorder %s2669_s27, 1 }
  0x5d   : > { %s1960_s12 = sshll.u32 %s366_s20, 2  ;;  %v2129_v15 = vld [vmem:[%s2881_s28 + $0x28] sm:$0xff]  ;;  %v2131_v16 = vld [vmem:[%s2881_s28 + $0x38] sm:$0xff]  ;;  %v386_v17 = vld [vmem:[%s2899_s3] sm:$0xff] }
  0x5e   : > { %v390_v18 = vld [vmem:[%s2899_s3 + $0x20] sm:$0xff]  ;;  %v387_v25 = vld [vmem:[%s2899_s3 + $0x8] sm:$0xff]  ;;  %v388_v37 = vld [vmem:[%s2899_s3 + $0x10] sm:$0xff] }
  0x5f   : > { %v394_v23 = vld [vmem:[%s2899_s3 + $0x40] sm:$0xff]  ;;  %v391_v26 = vld [vmem:[%s2899_s3 + $0x28] sm:$0xff]  ;;  %v392_v38 = vld [vmem:[%s2899_s3 + $0x30] sm:$0xff] }
  0x60   : > { %v398_v24 = vld [vmem:[%s2899_s3 + $0x60] sm:$0xff]  ;;  %v395_v35 = vld [vmem:[%s2899_s3 + $0x48] sm:$0xff]  ;;  %v396_v47 = vld [vmem:[%s2899_s3 + $0x50] sm:$0xff] }
  0x61   : > { %s2924_s5 = scalar_lea.vmem %s3923_s1, %s1960_s12  ;;  %v399_v36 = vld [vmem:[%s2899_s3 + $0x68] sm:$0xff]  ;;  %v400_v48 = vld [vmem:[%s2899_s3 + $0x70] sm:$0xff]  ;;  %v389_v49 = vld [vmem:[%s2899_s3 + $0x18] sm:$0xff] }
  0x62   : > { %v2123_v1 = vld [vmem:[%s2924_s5 + $0x38] sm:$0xff]  ;;  %v2122_v2 = vld [vmem:[%s2924_s5 + $0x30] sm:$0xff]  ;;  %v2121_v3 = vld [vmem:[%s2924_s5 + $0x28] sm:$0xff] }
  0x63   : > { %514 = vmatpush.bf16.msra.mxu0 %v2123_v1  ;;  %2197 = vmatpush.bf16.msra.mxu1 %v2123_v1  ;;  %v2120_v4 = vld [vmem:[%s2924_s5 + $0x20] sm:$0xff]  ;;  %v2119_v5 = vld [vmem:[%s2924_s5 + $0x18] sm:$0xff]  ;;  %v2118_v6 = vld [vmem:[%s2924_s5 + $0x10] sm:$0xff] }
  0x64   : > { %2198 = vmatpush.bf16.msra.mxu2 %v2123_v1  ;;  %2199 = vmatpush.bf16.msra.mxu3 %v2123_v1  ;;  %v2117_v7 = vld [vmem:[%s2924_s5 + $0x8] sm:$0xff]  ;;  %v2116_v8 = vld [vmem:[%s2924_s5] sm:$0xff]  ;;  %v393_v50 = vld [vmem:[%s2899_s3 + $0x38] sm:$0xff] }
  0x65   : > { %v397_v59 = vld [vmem:[%s2899_s3 + $0x58] sm:$0xff] }
  0x66   : > { %v401_v60 = vld [vmem:[%s2899_s3 + $0x78] sm:$0xff] }
  0x67   : > { %515 = vmatpush.bf16.msra.mxu0 %v2122_v2  ;;  %2200 = vmatpush.bf16.msra.mxu1 %v2122_v2 }
  0x68   : > { %2201 = vmatpush.bf16.msra.mxu2 %v2122_v2  ;;  %2202 = vmatpush.bf16.msra.mxu3 %v2122_v2 }
  0x6b   : > { %516 = vmatpush.bf16.msra.mxu0 %v2121_v3  ;;  %2203 = vmatpush.bf16.msra.mxu1 %v2121_v3 }
  0x6c   : > { %2204 = vmatpush.bf16.msra.mxu2 %v2121_v3  ;;  %2205 = vmatpush.bf16.msra.mxu3 %v2121_v3 }
  0x6f   : > { %517 = vmatpush.bf16.msra.mxu0 %v2120_v4  ;;  %2206 = vmatpush.bf16.msra.mxu1 %v2120_v4 }
  0x70   : > { %2207 = vmatpush.bf16.msra.mxu2 %v2120_v4  ;;  %2208 = vmatpush.bf16.msra.mxu3 %v2120_v4 }
  0x73   : > { %518 = vmatpush.bf16.msra.mxu0 %v2119_v5  ;;  %2209 = vmatpush.bf16.msra.mxu1 %v2119_v5 }
  0x74   : > { %2210 = vmatpush.bf16.msra.mxu2 %v2119_v5  ;;  %2211 = vmatpush.bf16.msra.mxu3 %v2119_v5 }
  0x77   : > { %519 = vmatpush.bf16.msra.mxu0 %v2118_v6  ;;  %2212 = vmatpush.bf16.msra.mxu1 %v2118_v6 }
  0x78   : > { %2213 = vmatpush.bf16.msra.mxu2 %v2118_v6  ;;  %2214 = vmatpush.bf16.msra.mxu3 %v2118_v6 }
  0x7b   : > { %520 = vmatpush.bf16.msra.mxu0 %v2117_v7  ;;  %2215 = vmatpush.bf16.msra.mxu1 %v2117_v7 }
  0x7c   : > { %2216 = vmatpush.bf16.msra.mxu2 %v2117_v7  ;;  %2217 = vmatpush.bf16.msra.mxu3 %v2117_v7 }
  0x7f   : > { %521 = vmatpush.bf16.msra.mxu0 %v2116_v8  ;;  %2218 = vmatpush.bf16.msra.mxu1 %v2116_v8 }
  0x80   : > { %2219 = vmatpush.bf16.msra.mxu2 %v2116_v8  ;;  %2220 = vmatpush.bf16.msra.mxu3 %v2116_v8 }
  0x82   : > { %522 = vmatmul.bf16.vlgmr.msra.gmra.mxu0 %v2124_v9  ;;  %532 = vmatmul.bf16.vlgmr.msra.gmra.mxu1 %v2126_v10 }
  0x83   : > { %542 = vmatmul.bf16.vlgmr.msra.gmra.mxu2 %v2128_v11  ;;  %552 = vmatmul.bf16.vlgmr.msra.gmra.mxu3 %v2130_v12 }
  0x92   : > { %527 = vmatmul.bf16.gmra.mxu0 %v2125_v13  ;;  %537 = vmatmul.bf16.gmra.mxu1 %v2127_v14 }
  0x93   : > { %547 = vmatmul.bf16.gmra.mxu2 %v2129_v15  ;;  %557 = vmatmul.bf16.gmra.mxu3 %v2131_v16 }
  0xff   : > { %v523_v19 = vpop.f32.mrf.mxu0  ;;  %v533_v20 = vpop.f32.mrf.mxu1 }
 0x100   : > { %v563_v21 = vadd.f32 %v523_v19, %v386_v17  ;;  %v567_v22 = vadd.f32 %v533_v20, %v390_v18 }
 0x102   : > { %579 = vst [vmem:[%s2899_s3] sm:$0xff] %v563_v21 }
 0x103   : > { %583 = vst [vmem:[%s2899_s3 + $0x20] sm:$0xff] %v567_v22 }
 0x106   : > { %v543_v27 = vpop.f32.mrf.mxu2  ;;  %v553_v28 = vpop.f32.mrf.mxu3 }
 0x107   : > { %v571_v29 = vadd.f32 %v543_v27, %v394_v23  ;;  %v575_v30 = vadd.f32 %v553_v28, %v398_v24  ;;  %v525_v31 = vpop.f32.mrf.mxu0  ;;  %v535_v32 = vpop.f32.mrf.mxu1 }
 0x108   : > { %v564_v33 = vadd.f32 %v525_v31, %v387_v25  ;;  %v568_v34 = vadd.f32 %v535_v32, %v391_v26 }
 0x109   : > { %587 = vst [vmem:[%s2899_s3 + $0x40] sm:$0xff] %v571_v29 }
 0x10a   : > { %591 = vst [vmem:[%s2899_s3 + $0x60] sm:$0xff] %v575_v30 }
 0x10b   : > { %580 = vst [vmem:[%s2899_s3 + $0x8] sm:$0xff] %v564_v33 }
 0x10c   : > { %584 = vst [vmem:[%s2899_s3 + $0x28] sm:$0xff] %v568_v34 }
 0x10e   : > { %v545_v39 = vpop.f32.mrf.mxu2  ;;  %v555_v40 = vpop.f32.mrf.mxu3 }
 0x10f   : > { %v572_v41 = vadd.f32 %v545_v39, %v395_v35  ;;  %v576_v42 = vadd.f32 %v555_v40, %v399_v36  ;;  %v528_v43 = vpop.f32.mrf.mxu0  ;;  %v538_v44 = vpop.f32.mrf.mxu1 }
 0x110   : > { %v565_v45 = vadd.f32 %v528_v43, %v388_v37  ;;  %v569_v46 = vadd.f32 %v538_v44, %v392_v38 }
 0x111   : > { %588 = vst [vmem:[%s2899_s3 + $0x48] sm:$0xff] %v572_v41 }
 0x112   : > { %592 = vst [vmem:[%s2899_s3 + $0x68] sm:$0xff] %v576_v42 }
 0x113   : > { %581 = vst [vmem:[%s2899_s3 + $0x10] sm:$0xff] %v565_v45 }
 0x114   : > { %585 = vst [vmem:[%s2899_s3 + $0x30] sm:$0xff] %v569_v46 }
 0x116   : > { %v548_v51 = vpop.f32.mrf.mxu2  ;;  %v558_v52 = vpop.f32.mrf.mxu3 }
 0x117   : > { %v573_v53 = vadd.f32 %v548_v51, %v396_v47  ;;  %v577_v54 = vadd.f32 %v558_v52, %v400_v48  ;;  %v530_v55 = vpop.f32.mrf.mxu0  ;;  %v540_v56 = vpop.f32.mrf.mxu1 }
 0x118   : > { %v566_v57 = vadd.f32 %v530_v55, %v389_v49  ;;  %v570_v58 = vadd.f32 %v540_v56, %v393_v50 }
 0x119   : > { %589 = vst [vmem:[%s2899_s3 + $0x50] sm:$0xff] %v573_v53 }
 0x11a   : > { %593 = vst [vmem:[%s2899_s3 + $0x70] sm:$0xff] %v577_v54 }
 0x11b   : > { %582 = vst [vmem:[%s2899_s3 + $0x18] sm:$0xff] %v566_v57 }
 0x11c   : > { %586 = vst [vmem:[%s2899_s3 + $0x38] sm:$0xff] %v570_v58 }
 0x11e   : > { %v550_v61 = vpop.f32.mrf.mxu2  ;;  %v560_v62 = vpop.f32.mrf.mxu3  ;;  %598 = sbr.rel (%p2025_p11) target bundleno = 915 (0x393), region = 56 }
 0x11f   : > { %v574_v63 = vadd.f32 %v550_v61, %v397_v59  ;;  %v578_v0 = vadd.f32 %v560_v62, %v401_v60 }
 0x121   : > { %590 = vst [vmem:[%s2899_s3 + $0x58] sm:$0xff] %v574_v63 }
 0x122   : > { %594 = vst [vmem:[%s2899_s3 + $0x78] sm:$0xff] %v578_v0 }
 0x123   : > { %v609_v1 = vld [vmem:[%s2899_s3 + $0x50] sm:$0xff]  ;;  %s3924_s4 = sld [smem:[#allocation25_spill]]  ;;  %v2989_v6 = vld [vmem:[%s2899_s3 + $0x40] sm:$0xff]  ;;  %v3007_v14 = vld [vmem:[%s2892_s9 + $0x58] sm:$0xff] }
 0x124   : > { %v625_v2 = vld [vmem:[%s2892_s9 + $0x50] sm:$0xff]  ;;  %v2992_v7 = vld [vmem:[%s2892_s9 + $0x40] sm:$0xff]  ;;  %v3017_v18 = vld [vmem:[%s2899_s3 + $0x48] sm:$0xff]  ;;  %s3949_s0 = sld [smem:[#allocation24_spill]] }
 0x125   : > { %v2995_v8 = vld [vmem:[%s2899_s3] sm:$0xff]  ;;  %v3020_v19 = vld [vmem:[%s2892_s9 + $0x48] sm:$0xff]  ;;  %v3047_v36 = vld [vmem:[%s2899_s3 + $0x10] sm:$0xff] }
 0x126   : > { %v2998_v9 = vld [vmem:[%s2892_s9] sm:$0xff]  ;;  %v3023_v22 = vld [vmem:[%s2899_s3 + $0x8] sm:$0xff]  ;;  %v3050_v37 = vld [vmem:[%s2892_s9 + $0x10] sm:$0xff] }
 0x127   : > { %v3026_v23 = vld [vmem:[%s2892_s9 + $0x8] sm:$0xff]  ;;  %v3041_v33 = vld [vmem:[%s2892_s9 + $0x60] sm:$0xff]  ;;  %v3053_v38 = vld [vmem:[%s2899_s3 + $0x18] sm:$0xff] }
 0x128   : > { %v3014_v17 = vld [vmem:[%s2899_s3 + $0x58] sm:$0xff]  ;;  %v3044_v35 = vld [vmem:[%s2899_s3 + $0x60] sm:$0xff]  ;;  %v3071_v48 = vld [vmem:[%s2892_s9 + $0x28] sm:$0xff] }
 0x129   : > { %v2980_v3 = vld [vmem:[%s3924_s4] sm:$0xff]  ;;  %v3056_v39 = vld [vmem:[%s2892_s9 + $0x18] sm:$0xff]  ;;  %v3074_v49 = vld [vmem:[%s2899_s3 + $0x28] sm:$0xff] }
 0x12a   : > { %v2983_v4 = vperm.slane %v2980_v3, 1  ;;  %v2986_v5 = vperm.slane %v2980_v3, 2  ;;  %v3077_v50 = vld [vmem:[%s2899_s3 + $0x68] sm:$0xff]  ;;  %v3083_v53 = vld [vmem:[%s2899_s3 + $0x20] sm:$0xff]  ;;  %v3101_v63 = vld [vmem:[%s2892_s9 + $0x70] sm:$0xff] }
 0x12b   : > { %v3080_v51 = vld [vmem:[%s2892_s9 + $0x68] sm:$0xff]  ;;  %v3086_v54 = vld [vmem:[%s2892_s9 + $0x20] sm:$0xff]  ;;  %v3104_v0 = vld [vmem:[%s2899_s3 + $0x70] sm:$0xff] }
 0x12c   : > { %v643_v10 = vmul.f32 %v2983_v4, %v625_v2  ;;  %v660_v11 = vmul.f32 %v2986_v5, %v609_v1  ;;  %v641_v12 = vmul.f32 %v2983_v4, %v2992_v7  ;;  %v658_v13 = vmul.f32 %v2986_v5, %v2989_v6  ;;  %v3107_v1 = vld [vmem:[%s2899_s3 + $0x30] sm:$0xff] }
 0x12d   : > { %v633_v15 = vmul.f32 %v2983_v4, %v2998_v9  ;;  %v650_v16 = vmul.f32 %v2986_v5, %v2995_v8  ;;  %v644_v25 = vmul.f32 %v2983_v4, %v3007_v14  ;;  %v661_v26 = vmul.f32 %v2986_v5, %v3014_v17  ;;  %v3110_v2 = vld [vmem:[%s2892_s9 + $0x30] sm:$0xff] }
 0x12e   : > { %v676_v20 = vadd.f32 %v660_v11, %v643_v10  ;;  %v674_v21 = vadd.f32 %v658_v13, %v641_v12  ;;  %v642_v27 = vmul.f32 %v2983_v4, %v3020_v19  ;;  %v659_v28 = vmul.f32 %v2986_v5, %v3017_v18  ;;  %v3113_v11 = vld [vmem:[%s2899_s3 + $0x78] sm:$0xff] }
 0x12f   : > { %v666_v24 = vadd.f32 %v650_v16, %v633_v15  ;;  %v634_v29 = vmul.f32 %v2983_v4, %v3026_v23  ;;  %v651_v30 = vmul.f32 %v2986_v5, %v3023_v22  ;;  %v677_v31 = vadd.f32 %v661_v26, %v644_v25  ;;  %3925 = vst [vmem:[#allocation19_spill] sm:$0xff] %v3113_v11  ;;  %v3116_v12 = vld [vmem:[%s2892_s9 + $0x78] sm:$0xff] }
 0x130   : > { %702 = vadd.xlane.f32.xlu2 %v676_v20  ;;  %698 = vadd.xlane.f32.xlu0 %v674_v21  ;;  %v675_v32 = vadd.f32 %v659_v28, %v642_v27  ;;  %v645_v40 = vmul.f32 %v2983_v4, %v3041_v33  ;;  %v662_v41 = vmul.f32 %v2986_v5, %v3044_v35  ;;  %v3131_v27 = vld [vmem:[%s2899_s3 + $0x38] sm:$0xff] }
 0x131   : > { %682 = vadd.xlane.f32.xlu1 %v666_v24  ;;  %v667_v34 = vadd.f32 %v651_v30, %v634_v29  ;;  %v635_v42 = vmul.f32 %v2983_v4, %v3050_v37  ;;  %v652_v43 = vmul.f32 %v2986_v5, %v3047_v36  ;;  %v636_v44 = vmul.f32 %v2983_v4, %v3056_v39  ;;  %v3134_v28 = vld [vmem:[%s2892_s9 + $0x38] sm:$0xff] }
 0x132   : > { %v653_v45 = vmul.f32 %v2986_v5, %v3053_v38  ;;  %v678_v46 = vadd.f32 %v662_v41, %v645_v40  ;;  %v638_v55 = vmul.f32 %v2983_v4, %v3071_v48  ;;  %v655_v56 = vmul.f32 %v2986_v5, %v3074_v49  ;;  %3926 = vst [vmem:[#allocation20_spill] sm:$0xff] %v3116_v12 }
 0x133   : > { %v668_v47 = vadd.f32 %v652_v43, %v635_v42  ;;  %v646_v57 = vmul.f32 %v2983_v4, %v3080_v51  ;;  %v663_v58 = vmul.f32 %v2986_v5, %v3077_v50  ;;  %v637_v59 = vmul.f32 %v2983_v4, %v3086_v54 }
 0x134   : > { %v669_v52 = vadd.f32 %v653_v45, %v636_v44  ;;  %v654_v60 = vmul.f32 %v2986_v5, %v3083_v53  ;;  %v671_v61 = vadd.f32 %v655_v56, %v638_v55  ;;  %v647_v13 = vmul.f32 %v2983_v4, %v3101_v63 }
 0x135   : > { %v679_v62 = vadd.f32 %v663_v58, %v646_v57  ;;  %v664_v15 = vmul.f32 %v2986_v5, %v3104_v0  ;;  %v639_v16 = vmul.f32 %v2983_v4, %v3110_v2  ;;  %v656_v20 = vmul.f32 %v2986_v5, %v3107_v1 }
 0x136   : > { %v670_v10 = vadd.f32 %v654_v60, %v637_v59  ;;  %v648_v21 = vmul.f32 %v2983_v4, %v3116_v12  ;;  %v665_v24 = vmul.f32 %v2986_v5, %v3113_v11  ;;  %v640_v30 = vmul.f32 %v2983_v4, %v3134_v28 }
 0x137   : > { %v680_v25 = vadd.f32 %v664_v15, %v647_v13  ;;  %v672_v26 = vadd.f32 %v656_v20, %v639_v16 }
 0x138   : > { %704 = vadd.xlane.f32.xlu2 %v677_v31  ;;  %700 = vadd.xlane.f32.xlu0 %v675_v32  ;;  %v681_v29 = vadd.f32 %v665_v24, %v648_v21  ;;  %v657_v31 = vmul.f32 %v2986_v5, %v3131_v27 }
 0x139   : > { %684 = vadd.xlane.f32.xlu1 %v667_v34  ;;  %v3141_v34 = vperm.slane %v2980_v3, 5 }
 0x13a   : > { %v673_v32 = vadd.f32 %v657_v31, %v640_v30 }
 0x140   : > { %706 = vadd.xlane.f32.xlu2 %v678_v46  ;;  %686 = vadd.xlane.f32.xlu0 %v668_v47  ;;  %v2692_v46 = vmov 0  }
 0x141   : > { %688 = vadd.xlane.f32.xlu1 %v669_v52  ;;  %2361 = vset.pattern.permute.xlu0 %v2692_v46 }
 0x142   : > { %2359 = vset.pattern.permute.xlu1 %v2692_v46  ;;  %2360 = vset.pattern.permute.xlu2 %v2692_v46 }
 0x148   : > { %692 = vadd.xlane.f32.xlu2 %v671_v61  ;;  %708 = vadd.xlane.f32.xlu0 %v679_v62 }
 0x149   : > { %690 = vadd.xlane.f32.xlu1 %v670_v10 }
 0x150   : > { %710 = vadd.xlane.f32.xlu0 %v680_v25  ;;  %694 = vadd.xlane.f32.xlu2 %v672_v26 }
 0x151   : > { %712 = vadd.xlane.f32.xlu1 %v681_v29 }
 0x158   : > { %696 = vadd.xlane.f32.xlu0 %v673_v32 }
 0x1a3   : > { %v703_v40 = vpop.xlane.xlu2 %702  ;;  %v699_v41 = vpop.xlane.xlu0 %698 }
 0x1a4   : > { %v725_v42 = vadd.f32 %v3141_v34, %v703_v40  ;;  %v723_v43 = vadd.f32 %v3141_v34, %v699_v41  ;;  %v683_v44 = vpop.xlane.xlu1 %682 }
 0x1a5   : > { %v715_v45 = vadd.f32 %v3141_v34, %v683_v44 }
 0x1a6   : > { %v2036_v4 = vmul.f32 -1.442695, %v725_v42  ;;  %v2034_v5 = vmul.f32 -1.442695, %v723_v43 }
 0x1a7   : > { %v2026_v47 = vmul.f32 -1.442695, %v715_v45 }
 0x1a8   : > { %2362 = vpow2.f32 %v2036_v4 }
 0x1a9   : > { %2364 = vpow2.f32 %v2034_v5 }
 0x1aa   : > { %2366 = vpow2.f32 %v2026_v47 }
 0x1ab   : > { %v705_v3 = vpop.xlane.xlu2 %704  ;;  %v701_v52 = vpop.xlane.xlu0 %700 }
 0x1ac   : > { %v726_v55 = vadd.f32 %v3141_v34, %v705_v3  ;;  %v724_v56 = vadd.f32 %v3141_v34, %v701_v52  ;;  %v685_v57 = vpop.xlane.xlu1 %684 }
 0x1ad   : > { %v716_v58 = vadd.f32 %v3141_v34, %v685_v57 }
 0x1ae   : > { %v2363_v59 = vpop.eup %2362  ;;  %v2037_v60 = vmul.f32 -1.442695, %v726_v55  ;;  %v2035_v15 = vmul.f32 -1.442695, %v724_v56 }
 0x1af   : > { %v2365_v61 = vpop.eup %2364  ;;  %v3149_v62 = vadd.f32 1.0, %v2363_v59  ;;  %v2027_v20 = vmul.f32 -1.442695, %v716_v58 }
 0x1b0   : > { %v2367_v10 = vpop.eup %2366  ;;  %v3151_v13 = vadd.f32 1.0, %v2365_v61  ;;  %2368 = vpow2.f32 %v2037_v60 }
 0x1b1   : > { %2370 = vrcp.f32 %v3149_v62  ;;  %v3154_v16 = vadd.f32 1.0, %v2367_v10  ;;  %v954_v5 = vand.u32 2147483647, %v3149_v62  ;;  %vm950_vm3 = vweird.f32 %v3149_v62 }
 0x1b2   : > { %2372 = vrcp.f32 %v3151_v13  ;;  %v924_v30 = vand.u32 2147483647, %v3151_v13  ;;  %v926_v32 = vand.u32 2147483648, %v3151_v13  ;;  %vm920_vm0 = vweird.f32 %v3151_v13 }
 0x1b3   : > { %2374 = vrcp.f32 %v3154_v16  ;;  %v707_v21 = vpop.xlane.xlu2 %706  ;;  %v687_v24 = vpop.xlane.xlu0 %686  ;;  %v806_v40 = vand.u32 2147483648, %v3154_v16  ;;  %v804_v44 = vand.u32 2147483647, %v3154_v16  ;;  %vm800_vm1 = vweird.f32 %v3154_v16 }
 0x1b4   : > { %2376 = vpow2.f32 %v2035_v15  ;;  %v727_v25 = vadd.f32 %v3141_v34, %v707_v21  ;;  %v717_v26 = vadd.f32 %v3141_v34, %v687_v24  ;;  %v689_v29 = vpop.xlane.xlu1 %688  ;;  %vm3176_vm2 = vcmp.eq.f32.partialorder %v924_v30, 8.507059e+37 }
 0x1b5   : > { %2378 = vpow2.f32 %v2027_v20  ;;  %v718_v31 = vadd.f32 %v3141_v34, %v689_v29  ;;  %v927_v57 = vor.u32 1.1754944e-38, %v926_v32  ;;  %v807_v58 = vor.u32 1.1754944e-38, %v806_v40 }
 0x1b6   : > { %v2369_v41 = vpop.eup %2368  ;;  %v2038_v42 = vmul.f32 -1.442695, %v727_v25  ;;  %v2028_v43 = vmul.f32 -1.442695, %v717_v26  ;;  %vm3182_vm4 = vcmp.eq.f32.partialorder %v804_v44, 8.507059e+37  ;;  %v956_v10 = vand.u32 2147483648, %v3149_v62 }
 0x1b7   : > { %v3165_v45 = vpop.eup %2370  ;;  %v3167_v46 = vadd.f32 1.0, %v2369_v41  ;;  %v2029_v4 = vmul.f32 -1.442695, %v718_v31  ;;  %vm3201_vm8 = vcmp.eq.f32.partialorder %v954_v5, 8.507059e+37 }
 0x1b8   : > { %v2373_v47 = vpop.eup %2372  ;;  %2380 = vpow2.f32 %v2038_v42  ;;  %v946_v3 = vmul.f32 %v3165_v45, %v3149_v62  ;;  %vm951_vm5 = vweird.f32 %v3165_v45 }
 0x1b9   : > { %v2375_v52 = vpop.eup %2374  ;;  %2382 = vrcp.f32 %v3167_v46  ;;  %v916_v55 = vmul.f32 %v2373_v47, %v3151_v13  ;;  %vm921_vm6 = vweird.f32 %v2373_v47  ;;  %vm3236_vm12 = vmor %vm950_vm3, %vm951_vm5 }
 0x1ba   : > { %v2377_v59 = vpop.eup %2376  ;;  %2384 = vpow2.f32 %v2028_v43  ;;  %v796_v60 = vmul.f32 %v2375_v52, %v3154_v16  ;;  %v947_v26 = vsub.f32 1.0, %v946_v3  ;;  %vm801_vm7 = vweird.f32 %v2375_v52  ;;  %vm922_vm9 = vmor %vm920_vm0, %vm921_vm6 }
 0x1bb   : > { %v2379_v15 = vpop.eup %2378  ;;  %v3188_v20 = vadd.f32 1.0, %v2377_v59  ;;  %v693_v21 = vpop.xlane.xlu2 %692  ;;  %2386 = vpow2.f32 %v2029_v4  ;;  %v917_v25 = vsub.f32 1.0, %v916_v55  ;;  %vm802_vm10 = vmor %vm800_vm1, %vm801_vm7 }
 0x1bc   : > { %v709_v24 = vpop.xlane.xlu0 %708  ;;  %v3190_v29 = vadd.f32 1.0, %v2379_v15  ;;  %v720_v30 = vadd.f32 %v3141_v34, %v693_v21  ;;  %v797_v32 = vsub.f32 1.0, %v796_v60  ;;  %v691_v41 = vpop.xlane.xlu1 %690  ;;  %v957_v21 = vor.u32 1.1754944e-38, %v956_v10 }
 0x1bd   : > { %v728_v31 = vadd.f32 %v3141_v34, %v709_v24  ;;  %2388 = vrcp.f32 %v3188_v20  ;;  %v918_v40 = vmul.f32 %v2373_v47, %v917_v25  ;;  %v939_v15 = vand.u32 2147483647, %v3188_v20 }
 0x1be   : > { %v2381_v42 = vpop.eup %2380  ;;  %2390 = vrcp.f32 %v3190_v29  ;;  %v2031_v43 = vmul.f32 -1.442695, %v720_v30  ;;  %v798_v4 = vmul.f32 %v2375_v52, %v797_v32  ;;  %v948_v30 = vmul.f32 %v3165_v45, %v947_v26 }
 0x1bf   : > { %v2039_v44 = vmul.f32 -1.442695, %v728_v31  ;;  %v3196_v3 = vpop.eup %2382  ;;  %v3198_v55 = vadd.f32 1.0, %v2381_v42  ;;  %v919_v59 = vadd.f32 %v2373_v47, %v918_v40  ;;  %v719_v31 = vadd.f32 %v3141_v34, %v691_v41 }
 0x1c0   : > { %v2385_v24 = vpop.eup %2384  ;;  %2392 = vpow2.f32 %v2031_v43  ;;  %v799_v25 = vadd.f32 %v2375_v52, %v798_v4  ;;  %v941_v10 = vand.u32 2147483648, %v3188_v20  ;;  %vm935_vm11 = vweird.f32 %v3188_v20 }
 0x1c1   : > { %v2387_v32 = vpop.eup %2386  ;;  %2394 = vrcp.f32 %v3198_v55  ;;  %v3211_v40 = vadd.f32 1.0, %v2385_v24  ;;  %v923_v5 = vsel %vm922_vm9, %v2373_v47, %v919_v59  ;;  %v949_v4 = vadd.f32 %v3165_v45, %v948_v30 }
 0x1c2   : > { %2396 = vpow2.f32 %v2039_v44  ;;  %v3217_v13 = vadd.f32 1.0, %v2387_v32  ;;  %v928_v26 = vsel %vm3176_vm2, %v927_v57, %v923_v5  ;;  %v803_v42 = vsel %vm802_vm10, %v2375_v52, %v799_v25 }
 0x1c3   : > { %v2389_v41 = vpop.eup %2388  ;;  %2398 = vrcp.f32 %v3211_v40  ;;  %1077 = vperm.xlu1 %2359, %v928_v26   ;;  %v808_v47 = vsel %vm3182_vm4, %v807_v58, %v803_v42  ;;  %v695_v43 = vpop.xlane.xlu2 %694  ;;  %v2030_v44 = vmul.f32 -1.442695, %v719_v31  ;;  %vm3240_vm13 = vcmp.eq.f32.partialorder %v939_v15, 8.507059e+37 }
 0x1c4   : > { %v711_v16 = vpop.xlane.xlu0 %710  ;;  %v3226_v59 = vpop.eup %2390  ;;  %2400 = vrcp.f32 %v3217_v13  ;;  %1037 = vperm.xlu0 %2361, %v808_v47   ;;  %v721_v56 = vadd.f32 %v3141_v34, %v695_v43  ;;  %v931_v57 = vmul.f32 %v2389_v41, %v3188_v20  ;;  %v942_v24 = vor.u32 1.1754944e-38, %v941_v10 }
 0x1c5   : > { %v729_v52 = vadd.f32 %v3141_v34, %v711_v16  ;;  %v953_v25 = vsel %vm3236_vm12, %v3165_v45, %v949_v4  ;;  %2402 = vpow2.f32 %v2030_v44  ;;  %vm936_vm14 = vweird.f32 %v2389_v41 }
 0x1c6   : > { %v2393_v30 = vpop.eup %2392  ;;  %v2032_v32 = vmul.f32 -1.442695, %v721_v56  ;;  %v932_v5 = vsub.f32 1.0, %v931_v57  ;;  %v834_v15 = vand.u32 2147483647, %v3211_v40  ;;  %v836_v42 = vand.u32 2147483648, %v3211_v40  ;;  %vm937_vm3 = vmor %vm935_vm11, %vm936_vm14 }
 0x1c7   : > { %v2040_v31 = vmul.f32 -1.442695, %v729_v52  ;;  %v3247_v62 = vpop.eup %2394  ;;  %v3249_v26 = vadd.f32 1.0, %v2393_v30  ;;  %v811_v10 = vmul.f32 %v3226_v59, %v3190_v29  ;;  %v958_v16 = vsel %vm3201_vm8, %v957_v21, %v953_v25 }
 0x1c8   : > { %v2397_v47 = vpop.eup %2396  ;;  %v933_v45 = vmul.f32 %v2389_v41, %v932_v5  ;;  %vm830_vm15 = vweird.f32 %v3211_v40  ;;  %vm815_vm0 = vweird.f32 %v3190_v29  ;;  %vm816_vm1 = vweird.f32 %v3226_v59 }
 0x1c9   : > { %2404 = vpow2.f32 %v2040_v31  ;;  %v2399_v43 = vpop.eup %2398  ;;  %v3259_v4 = vadd.f32 1.0, %v2397_v47  ;;  %vm3266_vm2 = vcmp.eq.f32.partialorder %v834_v15, 8.507059e+37  ;;  %v837_v21 = vor.u32 1.1754944e-38, %v836_v42  ;;  %vm3290_vm6 = vmor %vm815_vm0, %vm816_vm1 }
 0x1ca   : > { %2406 = vrcp.f32 %v3249_v26  ;;  %v3263_v44 = vpop.eup %2400  ;;  %v934_v52 = vadd.f32 %v2389_v41, %v933_v45  ;;  %v826_v56 = vmul.f32 %v2399_v43, %v3211_v40  ;;  %v812_v25 = vsub.f32 1.0, %v811_v10 }
 0x1cb   : > { %2408 = vpow2.f32 %v2032_v32  ;;  %v2403_v57 = vpop.eup %2402  ;;  %1087 = vperm.xlu1 %2359, %v958_v16   ;;  %v819_v30 = vand.u32 2147483647, %v3190_v29  ;;  %v821_v31 = vand.u32 2147483648, %v3190_v29  ;;  %v713_v32 = vpop.xlane.xlu1 %712  ;;  %vm831_vm4 = vweird.f32 %v2399_v43 }
 0x1cc   : > { %2410 = vrcp.f32 %v3259_v4  ;;  %v697_v58 = vpop.xlane.xlu0 %696  ;;  %v938_v5 = vsel %vm937_vm3, %v2389_v41, %v934_v52  ;;  %v3277_v47 = vadd.f32 1.0, %v2403_v57  ;;  %v827_v42 = vsub.f32 1.0, %v826_v56  ;;  %vm832_vm8 = vmor %vm830_vm15, %vm831_vm4 }
 0x1cd   : > { %v722_v15 = vadd.f32 %v3141_v34, %v697_v58  ;;  %v943_v45 = vsel %vm3240_vm13, %v942_v24, %v938_v5  ;;  %v813_v20 = vmul.f32 %v3226_v59, %v812_v25  ;;  %vm3282_vm5 = vcmp.eq.f32.partialorder %v819_v30, 8.507059e+37 }
 0x1ce   : > { %1082 = vperm.xlu2 %2360, %v943_v45   ;;  %v828_v11 = vmul.f32 %v2399_v43, %v827_v42  ;;  %v822_v61 = vor.u32 1.1754944e-38, %v821_v31  ;;  %v730_v24 = vadd.f32 %v3141_v34, %v713_v32  ;;  %2412 = vrcp.f32 %v3277_v47 }
 0x1cf   : > { %v2405_v10 = vpop.eup %2404  ;;  %v2033_v12 = vmul.f32 -1.442695, %v722_v15  ;;  %v814_v57 = vadd.f32 %v3226_v59, %v813_v20  ;;  %v976_v58 = vmul.f32 %v3247_v62, %v3198_v55  ;;  %vm980_vm7 = vweird.f32 %v3198_v55 }
 0x1d0   : > { %v3295_v52 = vpop.eup %2406  ;;  %v3297_v56 = vadd.f32 1.0, %v2405_v10  ;;  %v829_v29 = vadd.f32 %v2399_v43, %v828_v11  ;;  %v2041_v30 = vmul.f32 -1.442695, %v730_v24  ;;  %vm981_vm9 = vweird.f32 %v3247_v62 }
 0x1d1   : > { %v2409_v25 = vpop.eup %2408  ;;  %2414 = vpow2.f32 %v2033_v12  ;;  %v818_v32 = vsel %vm3290_vm6, %v3226_v59, %v814_v57  ;;  %v977_v5 = vsub.f32 1.0, %v976_v58  ;;  %v984_v11 = vand.u32 2147483647, %v3198_v55  ;;  %vm982_vm14 = vmor %vm980_vm7, %vm981_vm9 }
 0x1d2   : > { %v3304_v31 = vpop.eup %2410  ;;  %2416 = vrcp.f32 %v3297_v56  ;;  %v3307_v34 = vadd.f32 1.0, %v2409_v25  ;;  %v833_v12 = vsel %vm832_vm8, %v2399_v43, %v829_v29  ;;  %vm965_vm10 = vweird.f32 %v3167_v46 }
 0x1d3   : > { %2418 = vpow2.f32 %v2041_v30  ;;  %v838_v15 = vsel %vm3266_vm2, %v837_v21, %v833_v12  ;;  %v823_v40 = vsel %vm3282_vm5, %v822_v61, %v818_v32  ;;  %v978_v42 = vmul.f32 %v3247_v62, %v977_v5 }
 0x1d4   : > { %v986_v45 = vand.u32 2147483648, %v3198_v55  ;;  %2420 = vrcp.f32 %v3307_v34  ;;  %1047 = vperm.xlu1 %2359, %v838_v15   ;;  %vm3325_vm11 = vcmp.eq.f32.partialorder %v984_v11, 8.507059e+37  ;;  %v991_v43 = vmul.f32 %v3304_v31, %v3259_v4  ;;  %v3332_v60 = vpop.eup %2412 }
 0x1d5   : > { %vm995_vm12 = vweird.f32 %v3259_v4  ;;  %v979_v21 = vadd.f32 %v3247_v62, %v978_v42  ;;  %vm996_vm13 = vweird.f32 %v3304_v31  ;;  %v999_v20 = vand.u32 2147483647, %v3259_v4 }
 0x1d6   : > { %v1001_v16 = vand.u32 2147483648, %v3259_v4  ;;  %1042 = vperm.xlu2 %2360, %v823_v40   ;;  %v987_v41 = vor.u32 1.1754944e-38, %v986_v45  ;;  %v992_v61 = vsub.f32 1.0, %v991_v43  ;;  %v961_v24 = vmul.f32 %v3196_v3, %v3167_v46  ;;  %vm997_vm3 = vmor %vm995_vm12, %vm996_vm13  ;;  %v2146_v4 = vld [vmem:[%s3949_s0 + $0x70] sm:$0xff] }
 0x1d7   : > { %v2415_v10 = vpop.eup %2414  ;;  %v969_v57 = vand.u32 2147483647, %v3167_v46  ;;  %v983_v29 = vsel %vm982_vm14, %v3247_v62, %v979_v21  ;;  %vm3350_vm15 = vcmp.eq.f32.partialorder %v999_v20, 8.507059e+37  ;;  %vm966_vm0 = vweird.f32 %v3196_v3  ;;  %v2147_v21 = vld [vmem:[%s3949_s0 + $0x78] sm:$0xff] }
 0x1d8   : > { %v3345_v58 = vpop.eup %2416  ;;  %v3347_v25 = vadd.f32 1.0, %v2415_v10  ;;  %v988_v32 = vsel %vm3325_vm11, %v987_v41, %v983_v29  ;;  %v993_v5 = vmul.f32 %v3304_v31, %v992_v61  ;;  %v1002_v12 = vor.u32 1.1754944e-38, %v1001_v16  ;;  %v2139_v20 = vld [vmem:[%s3949_s0 + $0x38] sm:$0xff]  ;;  %1341 = vmatpush.bf16.msra.mxu1 %v2147_v21  ;;  %vm967_vm5 = vmor %vm965_vm10, %vm966_vm0  ;;  %2229 = vmatpush.bf16.msra.mxu3 %v2147_v21 }
 0x1d9   : > { %v2419_v55 = vpop.eup %2418  ;;  %v962_v11 = vsub.f32 1.0, %v961_v24  ;;  %vm3360_vm1 = vcmp.eq.f32.partialorder %v969_v57, 8.507059e+37  ;;  %v971_v62 = vand.u32 2147483648, %v3167_v46  ;;  %v871_v42 = vmul.f32 %v3295_v52, %v3249_v26  ;;  %1292 = vmatpush.bf16.msra.mxu0 %v2139_v20  ;;  %2221 = vmatpush.bf16.msra.mxu2 %v2139_v20  ;;  %v2145_v20 = vld [vmem:[%s3949_s0 + $0x68] sm:$0xff] }
 0x1da   : > { %v3358_v15 = vadd.f32 1.0, %v2419_v55  ;;  %v3367_v45 = vpop.eup %2420  ;;  %2422 = vrcp.f32 %v3347_v25  ;;  %v994_v59 = vadd.f32 %v3304_v31, %v993_v5  ;;  %vm875_vm2 = vweird.f32 %v3249_v26  ;;  %v2138_v5 = vld [vmem:[%s3949_s0 + $0x30] sm:$0xff] }
 0x1db   : > { %v963_v43 = vmul.f32 %v3196_v3, %v962_v11  ;;  %v872_v16 = vsub.f32 1.0, %v871_v42  ;;  %vm876_vm4 = vweird.f32 %v3295_v52  ;;  %v879_v10 = vand.u32 2147483647, %v3249_v26 }
 0x1dc   : > { %2424 = vrcp.f32 %v3358_v15  ;;  %1097 = vperm.xlu1 %2359, %v988_v32   ;;  %v998_v41 = vsel %vm997_vm3, %v3304_v31, %v994_v59  ;;  %v881_v24 = vand.u32 2147483648, %v3249_v26  ;;  %v1006_v57 = vmul.f32 %v3345_v58, %v3297_v56  ;;  %vm3421_vm8 = vmor %vm875_vm2, %vm876_vm4  ;;  %1342 = vmatpush.bf16.msra.mxu1 %v2146_v4 }
 0x1dd   : > { %v964_v61 = vadd.f32 %v3196_v3, %v963_v43  ;;  %v1003_v29 = vsel %vm3350_vm15, %v1002_v12, %v998_v41  ;;  %v972_v31 = vor.u32 1.1754944e-38, %v971_v62  ;;  %v873_v55 = vmul.f32 %v3295_v52, %v872_v16  ;;  %2230 = vmatpush.bf16.msra.mxu3 %v2146_v4  ;;  %1293 = vmatpush.bf16.msra.mxu0 %v2138_v5 }
 0x1de   : > { %vm3401_vm6 = vcmp.eq.f32.partialorder %v879_v10, 8.507059e+37  ;;  %1102 = vperm.xlu0 %2361, %v1003_v29   ;;  %v882_v12 = vor.u32 1.1754944e-38, %v881_v24  ;;  %v1007_v11 = vsub.f32 1.0, %v1006_v57  ;;  %vm1010_vm7 = vweird.f32 %v3297_v56  ;;  %2222 = vmatpush.bf16.msra.mxu2 %v2138_v5 }
 0x1df   : > { %v968_v30 = vsel %vm967_vm5, %v3196_v3, %v964_v61  ;;  %v874_v62 = vadd.f32 %v3295_v52, %v873_v55  ;;  %v1014_v42 = vand.u32 2147483647, %v3297_v56  ;;  %v1016_v59 = vand.u32 2147483648, %v3297_v56  ;;  %v2137_v61 = vld [vmem:[%s3949_s0 + $0x28] sm:$0xff]  ;;  %v2144_v56 = vld [vmem:[%s3949_s0 + $0x60] sm:$0xff] }
 0x1e0   : > { %v973_v46 = vsel %vm3360_vm1, %v972_v31, %v968_v30  ;;  %v3415_v43 = vpop.eup %2422  ;;  %v1008_v40 = vmul.f32 %v3345_v58, %v1007_v11  ;;  %vm1011_vm9 = vweird.f32 %v3345_v58  ;;  %v841_v21 = vmul.f32 %v3263_v44, %v3217_v13  ;;  %1343 = vmatpush.bf16.msra.mxu1 %v2145_v20 }
 0x1e1   : > { %1092 = vperm.xlu2 %2360, %v973_v46   ;;  %vm845_vm10 = vweird.f32 %v3217_v13  ;;  %v878_v26 = vsel %vm3421_vm8, %v3295_v52, %v874_v62  ;;  %vm3438_vm11 = vcmp.eq.f32.partialorder %v1014_v42, 8.507059e+37  ;;  %v1017_v41 = vor.u32 1.1754944e-38, %v1016_v59  ;;  %vm1012_vm13 = vmor %vm1010_vm7, %vm1011_vm9  ;;  %2231 = vmatpush.bf16.msra.mxu3 %v2145_v20  ;;  %v2140_v20 = vld [vmem:[%s3949_s0 + $0x40] sm:$0xff] }
 0x1e2   : > { %v3433_v16 = vpop.eup %2424  ;;  %vm846_vm12 = vweird.f32 %v3263_v44  ;;  %v1009_v24 = vadd.f32 %v3345_v58, %v1008_v40  ;;  %v842_v57 = vsub.f32 1.0, %v841_v21  ;;  %v849_v29 = vand.u32 2147483647, %v3217_v13  ;;  %1294 = vmatpush.bf16.msra.mxu0 %v2137_v61  ;;  %2223 = vmatpush.bf16.msra.mxu2 %v2137_v61 }
 0x1e3   : > { %v851_v52 = vand.u32 2147483648, %v3217_v13  ;;  %v883_v31 = vsel %vm3401_vm6, %v882_v12, %v878_v26  ;;  %v886_v4 = vmul.f32 %v3367_v45, %v3307_v34  ;;  %vm890_vm14 = vweird.f32 %v3307_v34  ;;  %vm3471_vm0 = vmor %vm845_vm10, %vm846_vm12 }
 0x1e4   : > { %vm891_vm15 = vweird.f32 %v3367_v45  ;;  %1062 = vperm.xlu1 %2359, %v883_v31   ;;  %v1013_v55 = vsel %vm1012_vm13, %v3345_v58, %v1009_v24  ;;  %v843_v5 = vmul.f32 %v3263_v44, %v842_v57  ;;  %v894_v32 = vand.u32 2147483647, %v3307_v34  ;;  %1344 = vmatpush.bf16.msra.mxu1 %v2144_v56 }
 0x1e5   : > { %v852_v30 = vor.u32 1.1754944e-38, %v851_v52  ;;  %v1018_v12 = vsel %vm3438_vm11, %v1017_v41, %v1013_v55  ;;  %v887_v58 = vsub.f32 1.0, %v886_v4  ;;  %v896_v46 = vand.u32 2147483648, %v3307_v34  ;;  %vm3492_vm4 = vmor %vm890_vm14, %vm891_vm15  ;;  %2232 = vmatpush.bf16.msra.mxu3 %v2144_v56 }
 0x1e6   : > { %v901_v62 = vmul.f32 %v3415_v43, %v3347_v25  ;;  %1107 = vperm.xlu0 %2361, %v1018_v12   ;;  %v844_v42 = vadd.f32 %v3263_v44, %v843_v5  ;;  %vm850_vm1 = vcmp.eq.f32.partialorder %v849_v29, 8.507059e+37  ;;  %vm3479_vm2 = vcmp.eq.f32.partialorder %v894_v32, 8.507059e+37 }
 0x1e7   : > { %v888_v13 = vmul.f32 %v3367_v45, %v887_v58  ;;  %v897_v3 = vor.u32 1.1754944e-38, %v896_v46  ;;  %vm905_vm3 = vweird.f32 %v3347_v25  ;;  %v909_v26 = vand.u32 2147483647, %v3347_v25 }
 0x1e8   : > { %v902_v40 = vsub.f32 1.0, %v901_v62  ;;  %v848_v21 = vsel %vm3471_vm0, %v3263_v44, %v844_v42  ;;  %v911_v10 = vand.u32 2147483648, %v3347_v25  ;;  %v856_v41 = vmul.f32 %v3332_v60, %v3277_v47  ;;  %v2143_v44 = vld [vmem:[%s3949_s0 + $0x58] sm:$0xff] }
 0x1e9   : > { %v853_v61 = vsel %vm850_vm1, %v852_v30, %v848_v21  ;;  %v889_v24 = vadd.f32 %v3367_v45, %v888_v13  ;;  %vm906_vm5 = vweird.f32 %v3415_v43  ;;  %vm860_vm6 = vweird.f32 %v3277_v47  ;;  %1345 = vmatpush.bf16.msra.mxu1 %v2143_v44  ;;  %2233 = vmatpush.bf16.msra.mxu3 %v2143_v44  ;;  %v2134_v21 = vld [vmem:[%s3949_s0 + $0x10] sm:$0xff] }
 0x1ea   : > { %v903_v34 = vmul.f32 %v3415_v43, %v902_v40  ;;  %1052 = vperm.xlu2 %2360, %v853_v61   ;;  %v857_v57 = vsub.f32 1.0, %v856_v41  ;;  %vm861_vm7 = vweird.f32 %v3332_v60  ;;  %v864_v29 = vand.u32 2147483647, %v3277_v47  ;;  %vm907_vm8 = vmor %vm905_vm3, %vm906_vm5  ;;  %v2136_v40 = vld [vmem:[%s3949_s0 + $0x20] sm:$0xff]  ;;  %v2133_v41 = vld [vmem:[%s3949_s0 + $0x8] sm:$0xff] }
 0x1eb   : > { %v893_v52 = vsel %vm3492_vm4, %v3367_v45, %v889_v24  ;;  %v866_v4 = vand.u32 2147483648, %v3277_v47  ;;  %v1021_v55 = vmul.f32 %v3433_v16, %v3358_v15  ;;  %vm910_vm9 = vcmp.eq.f32.partialorder %v909_v26, 8.507059e+37  ;;  %vm862_vm10 = vmor %vm860_vm6, %vm861_vm7  ;;  %1295 = vmatpush.bf16.msra.mxu0 %v2136_v40  ;;  %2224 = vmatpush.bf16.msra.mxu2 %v2136_v40  ;;  %v3962_v40 = vld [vmem:[#allocation19_spill] sm:$0xff] }
 0x1ec   : > { %v904_v31 = vadd.f32 %v3415_v43, %v903_v34  ;;  %v898_v5 = vsel %vm3479_vm2, %v897_v3, %v893_v52  ;;  %v912_v30 = vor.u32 1.1754944e-38, %v911_v10  ;;  %v858_v32 = vmul.f32 %v3332_v60, %v857_v57 }
 0x1ed   : > { %1067 = vperm.xlu1 %2359, %v898_v5   ;;  %vm865_vm11 = vcmp.eq.f32.partialorder %v864_v29, 8.507059e+37  ;;  %v867_v56 = vor.u32 1.1754944e-38, %v866_v4  ;;  %v1022_v12 = vsub.f32 1.0, %v1021_v55  ;;  %vm1025_vm12 = vweird.f32 %v3358_v15 }
 0x1ee   : > { %v908_v45 = vsel %vm907_vm8, %v3415_v43, %v904_v31  ;;  %v859_v58 = vadd.f32 %v3332_v60, %v858_v32  ;;  %vm1026_vm13 = vweird.f32 %v3433_v16  ;;  %v1031_v46 = vand.u32 2147483648, %v3358_v15 }
 0x1ef   : > { %v913_v11 = vsel %vm910_vm9, %v912_v30, %v908_v45  ;;  %v1023_v25 = vmul.f32 %v3433_v16, %v1022_v12  ;;  %v1029_v47 = vand.u32 2147483647, %v3358_v15  ;;  %vm1027_vm14 = vmor %vm1025_vm12, %vm1026_vm13  ;;  %v2135_v15 = vld [vmem:[%s3949_s0 + $0x18] sm:$0xff]  ;;  %v1131_v26 = vmul.f32 %v2998_v9, %v2995_v8  ;;  %v2460_v30 = vld [vmem:[%s2899_s3 + $0x40] sm:$0xff] }
 0x1f0   : > { %1072 = vperm.xlu0 %2361, %v913_v11   ;;  %v863_v43 = vsel %vm862_vm10, %v3332_v60, %v859_v58  ;;  %v1032_v59 = vor.u32 1.1754944e-38, %v1031_v46  ;;  %v2142_v60 = vld [vmem:[%s3949_s0 + $0x50] sm:$0xff]  ;;  %1296 = vmatpush.bf16.msra.mxu0 %v2135_v15  ;;  %v1132_v10 = vmul.f32 %v3026_v23, %v3023_v22  ;;  %v1139_v8 = vmul.f32 %v2992_v7, %v2989_v6  ;;  %v2132_v23 = vld [vmem:[%s3949_s0] sm:$0xff] }
 0x1f1   : > { %v868_v62 = vsel %vm865_vm11, %v867_v56, %v863_v43  ;;  %v1024_v42 = vadd.f32 %v3433_v16, %v1023_v25  ;;  %vm1030_vm15 = vcmp.eq.f32.partialorder %v1029_v47, 8.507059e+37  ;;  %1346 = vmatpush.bf16.msra.mxu1 %v2142_v60  ;;  %2234 = vmatpush.bf16.msra.mxu3 %v2142_v60  ;;  %v1140_v9 = vmul.f32 %v3020_v19, %v3017_v18  ;;  %v2458_v7 = vld [vmem:[%s2899_s3 + $0x50] sm:$0xff]  ;;  %v2461_v56 = vld [vmem:[%s2899_s3] sm:$0xff] }
 0x1f2   : > { %1057 = vperm.xlu2 %2360, %v868_v62   ;;  %2225 = vmatpush.bf16.msra.mxu2 %v2135_v15  ;;  %v1148_v44 = vpack.c.bf16 %v1132_v10, %v1131_v26  ;;  %v1133_v24 = vmul.f32 %v3050_v37, %v3047_v36  ;;  %v1134_v34 = vmul.f32 %v3056_v39, %v3053_v38  ;;  %v2459_v19 = vld [vmem:[%s2892_s9 + $0x50] sm:$0xff]  ;;  %v2464_v26 = vld [vmem:[%s2899_s3 + $0x60] sm:$0xff] }
 0x1f3   : > { %v1028_v13 = vsel %vm1027_vm14, %v3433_v16, %v1024_v42  ;;  %v2141_v16 = vld [vmem:[%s3949_s0 + $0x48] sm:$0xff]  ;;  %v1156_v61 = vpack.c.bf16 %v1140_v9, %v1139_v8  ;;  %v1141_v29 = vmul.f32 %v2459_v19, %v2458_v7  ;;  %v1142_v52 = vmul.f32 %v3007_v14, %v3014_v17  ;;  %v2463_v42 = vld [vmem:[%s2899_s3 + $0x10] sm:$0xff] }
 0x1f4   : > { %v1033_v3 = vsel %vm1030_vm15, %v1032_v59, %v1028_v13  ;;  %1297 = vmatpush.bf16.msra.mxu0 %v2134_v21  ;;  %v1150_v57 = vpack.c.bf16 %v1134_v34, %v1133_v24  ;;  %v1135_v36 = vmul.f32 %v3086_v54, %v3083_v53  ;;  %v1136_v37 = vmul.f32 %v3071_v48, %v3074_v49  ;;  %v2465_v8 = vld [vmem:[%s2899_s3 + $0x28] sm:$0xff] }
 0x1f5   : > { %1347 = vmatpush.bf16.msra.mxu1 %v2141_v16  ;;  %2235 = vmatpush.bf16.msra.mxu3 %v2141_v16  ;;  %v1158_v31 = vpack.c.bf16 %v1142_v52, %v1141_v29  ;;  %v1143_v54 = vmul.f32 %v3041_v33, %v3044_v35  ;;  %v1144_v48 = vmul.f32 %v3080_v51, %v3077_v50  ;;  %v2462_v33 = vld [vmem:[%s2899_s3 + $0x58] sm:$0xff] }
 0x1f6   : > { %2226 = vmatpush.bf16.msra.mxu2 %v2134_v21  ;;  %v1152_v14 = vpack.c.bf16 %v1136_v37, %v1135_v36  ;;  %v1138_v25 = vmul.f32 %v3134_v28, %v3131_v27  ;;  %v3963_v28 = vld [vmem:[#allocation20_spill] sm:$0xff] }
 0x1f7   : > { %v1160_v58 = vpack.c.bf16 %v1144_v48, %v1143_v54  ;;  %v1146_v60 = vmul.f32 %v3963_v28, %v3962_v40 }
 0x1f8   : > { %1298 = vmatpush.bf16.msra.mxu0 %v2133_v41 }
 0x1f9   : > { %1348 = vmatpush.bf16.msra.mxu1 %v2140_v20  ;;  %2236 = vmatpush.bf16.msra.mxu3 %v2140_v20 }
 0x1fa   : > { %1112 = vperm.xlu2 %2360, %v1033_v3   ;;  %2227 = vmatpush.bf16.msra.mxu2 %v2133_v41 }
 0x1fc   : > { %1349 = vmatmul.bf16.vlgmr.msra.gmra.mxu1 %v1148_v44  ;;  %1299 = vmatpush.bf16.msra.mxu0 %v2132_v23 }
 0x1fd   : > { %1369 = vmatmul.bf16.vlgmr.msra.gmra.mxu3 %v1156_v61 }
 0x1fe   : > { %2228 = vmatpush.bf16.msra.mxu2 %v2132_v23 }
 0x20c   : > { %1354 = vmatmul.bf16.gmra.mxu1 %v1150_v57 }
 0x20d   : > { %1374 = vmatmul.bf16.gmra.mxu3 %v1158_v31 }
 0x21c   : > { %1359 = vmatmul.bf16.gmra.mxu1 %v1152_v14 }
 0x21d   : > { %1379 = vmatmul.bf16.gmra.mxu3 %v1160_v58 }
 0x228   : > { %v1083_v6 = vpop.permute.xlu2 %1082 }
 0x229   : > { %v1124_v39 = vmul.f32 %v1083_v6, %v3017_v18 }
 0x230   : > { %v1043_v4 = vpop.permute.xlu2 %1042 }
 0x231   : > { %v1116_v45 = vmul.f32 %v1043_v4, %v3023_v22  ;;  %v1137_v22 = vmul.f32 %v3110_v2, %v3107_v1  ;;  %v1145_v2 = vmul.f32 %v3101_v63, %v3104_v0  ;;  %v2466_v4 = vld [vmem:[%s3924_s4] sm:$0xff] }
 0x233   : > { %v1154_v47 = vpack.c.bf16 %v1138_v25, %v1137_v22  ;;  %v1162_v15 = vpack.c.bf16 %v1146_v60, %v1145_v2 }
 0x235   : > { %v1078_v55 = vpop.permute.xlu1 %1077  ;;  %1364 = vmatmul.bf16.gmra.mxu1 %v1154_v47  ;;  %1384 = vmatmul.bf16.gmra.mxu3 %v1162_v15 }
 0x236   : > { %v1038_v5 = vpop.permute.xlu0 %1037  ;;  %v1123_v32 = vmul.f32 %v2460_v30, %v1078_v55  ;;  %v3607_v55 = vperm.slane %v2466_v4, 0 }
 0x237   : > { %v1115_v12 = vmul.f32 %v2461_v56, %v1038_v5 }
 0x238   : > { %v1155_v17 = vpack.c.bf16 %v1124_v39, %v1123_v32  ;;  %v3610_v39 = vperm.slane %v2466_v4, 3 }
 0x239   : > { %v1147_v11 = vpack.c.bf16 %v1116_v45, %v1115_v12  ;;  %v3613_v45 = vperm.slane %v2466_v4, 4 }
 0x23a   : > { %1320 = vmatmul.bf16.vlgmr.msra.gmra.mxu2 %v1155_v17 }
 0x23b   : > { %v1093_v18 = vpop.permute.xlu2 %1092  ;;  %1300 = vmatmul.bf16.vlgmr.msra.gmra.mxu0 %v1147_v11 }
 0x23c   : > { %v1126_v35 = vmul.f32 %v2462_v33, %v1093_v18 }
 0x23d   : > { %v1088_v49 = vpop.permute.xlu1 %1087 }
 0x23e   : > { %v1125_v43 = vmul.f32 %v2458_v7, %v1088_v49 }
 0x240   : > { %v1157_v13 = vpack.c.bf16 %v1126_v35, %v1125_v43 }
 0x244   : > { %v1053_v46 = vpop.permute.xlu2 %1052 }
 0x245   : > { %v1118_v51 = vmul.f32 %v1053_v46, %v3053_v38 }
 0x246   : > { %v1048_v62 = vpop.permute.xlu1 %1047 }
 0x247   : > { %v1117_v59 = vmul.f32 %v2463_v42, %v1048_v62 }
 0x249   : > { %v1149_v3 = vpack.c.bf16 %v1118_v51, %v1117_v59 }
 0x24a   : > { %1325 = vmatmul.bf16.gmra.mxu2 %v1157_v13 }
 0x24b   : > { %1305 = vmatmul.bf16.gmra.mxu0 %v1149_v3 }
 0x24c   : > { %v1058_v38 = vpop.permute.xlu2 %1057 }
 0x24d   : > { %v1119_v44 = vmul.f32 %v1058_v38, %v3083_v53 }
 0x24e   : > { %v1098_v16 = vpop.permute.xlu1 %1097 }
 0x24f   : > { %v1127_v10 = vmul.f32 %v2464_v26, %v1098_v16 }
 0x250   : > { %v1103_v21 = vpop.permute.xlu0 %1102 }
 0x251   : > { %v1128_v20 = vmul.f32 %v1103_v21, %v3077_v50 }
 0x253   : > { %v1159_v23 = vpack.c.bf16 %v1128_v20, %v1127_v10 }
 0x254   : > { %v1113_v57 = vpop.permute.xlu2 %1112 }
 0x255   : > { %v1130_v19 = vmul.f32 %v1113_v57, %v3962_v40 }
 0x256   : > { %v1063_v41 = vpop.permute.xlu1 %1062 }
 0x257   : > { %v1120_v9 = vmul.f32 %v2465_v8, %v1063_v41 }
 0x258   : > { %v1108_v63 = vpop.permute.xlu0 %1107 }
 0x259   : > { %v1151_v61 = vpack.c.bf16 %v1120_v9, %v1119_v44  ;;  %v1129_v6 = vmul.f32 %v1108_v63, %v3104_v0 }
 0x25a   : > { %1330 = vmatmul.bf16.gmra.mxu2 %v1159_v23 }
 0x25b   : > { %1310 = vmatmul.bf16.gmra.mxu0 %v1151_v61  ;;  %v1161_v29 = vpack.c.bf16 %v1130_v19, %v1129_v6 }
 0x25f   : > { %v1068_v34 = vpop.permute.xlu1 %1067 }
 0x260   : > { %v1121_v50 = vmul.f32 %v1068_v34, %v3107_v1 }
 0x262   : > { %v1073_v24 = vpop.permute.xlu0 %1072 }
 0x263   : > { %v1122_v7 = vmul.f32 %v1073_v24, %v3131_v27 }
 0x265   : > { %v1153_v53 = vpack.c.bf16 %v1122_v7, %v1121_v50 }
 0x26a   : > { %1335 = vmatmul.bf16.gmra.mxu2 %v1161_v29 }
 0x26b   : > { %1315 = vmatmul.bf16.gmra.mxu0 %v1153_v53 }
 0x279   : > { %v1350_v52 = vpop.f32.mrf.mxu1 }
 0x280   : > { %v1370_v31 = vpop.f32.mrf.mxu3 }
 0x281   : > { %v1352_v36 = vpop.f32.mrf.mxu1 }
 0x288   : > { %v1372_v1 = vpop.f32.mrf.mxu3 }
 0x289   : > { %v1355_v17 = vpop.f32.mrf.mxu1 }
 0x290   : > { %v1375_v43 = vpop.f32.mrf.mxu3 }
 0x291   : > { %v1357_v2 = vpop.f32.mrf.mxu1 }
 0x298   : > { %v1377_v10 = vpop.f32.mrf.mxu3 }
 0x299   : > { %v1360_v57 = vpop.f32.mrf.mxu1 }
 0x2b8   : > { %v1301_v0 = vpop.f32.mrf.mxu0 }
 0x2b9   : > { %v1302_v27 = vadd.f32 %v1301_v0, %v3607_v55 }
 0x2bb   : > { %v1351_v37 = vadd.f32 %v1350_v52, %v1302_v27 }
 0x2bd   : > { %vm1390_vm0 = vcmp.ge.f32.partialorder %v1351_v37, 0.0  ;;  %v1406_v5 = vmul.f32 0.2, %v1351_v37  ;;  %v1321_v30 = vpop.f32.mrf.mxu2 }
 0x2be   : > { %v1322_v32 = vadd.f32 %v1321_v30, %v3607_v55 }
 0x2bf   : > { %v1422_v56 = vsel %vm1390_vm0, %v1351_v37, %v1406_v5  ;;  %v1380_v37 = vpop.f32.mrf.mxu3 }
 0x2c0   : > { %v1371_v12 = vadd.f32 %v1370_v31, %v1322_v32  ;;  %v1303_v14 = vpop.f32.mrf.mxu0  ;;  %v1439_v11 = vmul.f32 %v3610_v39, %v1422_v56 }
 0x2c1   : > { %v1304_v54 = vadd.f32 %v1303_v14, %v3607_v55 }
 0x2c2   : > { %vm1398_vm1 = vcmp.ge.f32.partialorder %v1371_v12, 0.0  ;;  %v1414_v48 = vmul.f32 0.2, %v1371_v12  ;;  %v3618_v18 = vadd.f32 %v3613_v45, %v1439_v11 }
 0x2c3   : > { %v1353_v49 = vadd.f32 %v1352_v36, %v1304_v54 }
 0x2c4   : > { %v1472_v58 = vmul.f32 %v3618_v18, %v3618_v18  ;;  %v1430_v22 = vsel %vm1398_vm1, %v1371_v12, %v1414_v48  ;;  %v1362_v48 = vpop.f32.mrf.mxu1 }
 0x2c5   : > { %vm1391_vm2 = vcmp.ge.f32.partialorder %v1353_v49, 0.0  ;;  %v1407_v25 = vmul.f32 0.2, %v1353_v49  ;;  %v1323_v46 = vpop.f32.mrf.mxu2  ;;  %v1447_v47 = vmul.f32 %v3610_v39, %v1430_v22 }
 0x2c6   : > { %1488 = vadd.xlane.f32.xlu2 %v1472_v58  ;;  %v1324_v33 = vadd.f32 %v1323_v46, %v3607_v55 }
 0x2c7   : > { %v1423_v35 = vsel %vm1391_vm2, %v1353_v49, %v1407_v25  ;;  %v3626_v59 = vadd.f32 %v3613_v45, %v1447_v47 }
 0x2c8   : > { %v1373_v62 = vadd.f32 %v1372_v1, %v1324_v33  ;;  %v1306_v51 = vpop.f32.mrf.mxu0  ;;  %v1440_v42 = vmul.f32 %v3610_v39, %v1423_v35 }
 0x2c9   : > { %v1307_v13 = vadd.f32 %v1306_v51, %v3607_v55  ;;  %v1480_v15 = vmul.f32 %v3626_v59, %v3626_v59  ;;  %v1382_v51 = vpop.f32.mrf.mxu3 }
 0x2ca   : > { %vm1399_vm3 = vcmp.ge.f32.partialorder %v1373_v62, 0.0  ;;  %v1415_v3 = vmul.f32 0.2, %v1373_v62  ;;  %v3630_v40 = vadd.f32 %v3613_v45, %v1440_v42 }
 0x2cb   : > { %v1356_v28 = vadd.f32 %v1355_v17, %v1307_v13 }
 0x2cc   : > { %v1473_v60 = vmul.f32 %v3630_v40, %v3630_v40  ;;  %v1431_v16 = vsel %vm1399_vm3, %v1373_v62, %v1415_v3 }
 0x2cd   : > { %vm1392_vm4 = vcmp.ge.f32.partialorder %v1356_v28, 0.0  ;;  %v1408_v21 = vmul.f32 0.2, %v1356_v28  ;;  %v1326_v38 = vpop.f32.mrf.mxu2  ;;  %v1448_v20 = vmul.f32 %v3610_v39, %v1431_v16 }
 0x2ce   : > { %1490 = vadd.xlane.f32.xlu1 %v1473_v60  ;;  %1504 = vadd.xlane.f32.xlu2 %v1480_v15  ;;  %v1327_v26 = vadd.f32 %v1326_v38, %v3607_v55  ;;  %v1365_v38 = vpop.f32.mrf.mxu1 }
 0x2cf   : > { %v3639_v41 = vadd.f32 %v3613_v45, %v1448_v20  ;;  %v1424_v44 = vsel %vm1392_vm4, %v1356_v28, %v1408_v21 }
 0x2d0   : > { %v1376_v8 = vadd.f32 %v1375_v43, %v1327_v26  ;;  %v1308_v9 = vpop.f32.mrf.mxu0  ;;  %v1441_v61 = vmul.f32 %v3610_v39, %v1424_v44 }
 0x2d1   : > { %v1309_v63 = vadd.f32 %v1308_v9, %v3607_v55  ;;  %v1481_v23 = vmul.f32 %v3639_v41, %v3639_v41 }
 0x2d2   : > { %vm1400_vm5 = vcmp.ge.f32.partialorder %v1376_v8, 0.0  ;;  %v1416_v24 = vmul.f32 0.2, %v1376_v8  ;;  %v3647_v29 = vadd.f32 %v3613_v45, %v1441_v61 }
 0x2d3   : > { %v1358_v34 = vadd.f32 %v1357_v2, %v1309_v63  ;;  %1506 = vadd.xlane.f32.xlu0 %v1481_v23 }
 0x2d4   : > { %v1432_v6 = vsel %vm1400_vm5, %v1376_v8, %v1416_v24  ;;  %v1474_v5 = vmul.f32 %v3647_v29, %v3647_v29 }
 0x2d5   : > { %vm1393_vm6 = vcmp.ge.f32.partialorder %v1358_v34, 0.0  ;;  %v1409_v7 = vmul.f32 0.2, %v1358_v34  ;;  %v1328_v50 = vpop.f32.mrf.mxu2  ;;  %v1449_v19 = vmul.f32 %v3610_v39, %v1432_v6 }
 0x2d6   : > { %v1329_v53 = vadd.f32 %v1328_v50, %v3607_v55 }
 0x2d7   : > { %v3651_v52 = vadd.f32 %v3613_v45, %v1449_v19  ;;  %v1425_v31 = vsel %vm1393_vm6, %v1358_v34, %v1409_v7 }
 0x2d8   : > { %v1378_v4 = vadd.f32 %v1377_v10, %v1329_v53  ;;  %v1311_v36 = vpop.f32.mrf.mxu0  ;;  %v1442_v0 = vmul.f32 %v3610_v39, %v1425_v31 }
 0x2d9   : > { %v1312_v27 = vadd.f32 %v1311_v36, %v3607_v55  ;;  %v1482_v1 = vmul.f32 %v3651_v52, %v3651_v52 }
 0x2da   : > { %vm1401_vm7 = vcmp.ge.f32.partialorder %v1378_v4, 0.0  ;;  %v1417_v30 = vmul.f32 0.2, %v1378_v4  ;;  %v3660_v32 = vadd.f32 %v3613_v45, %v1442_v0 }
 0x2db   : > { %v1361_v56 = vadd.f32 %v1360_v57, %v1312_v27  ;;  %1508 = vadd.xlane.f32.xlu1 %v1482_v1  ;;  %1492 = vadd.xlane.f32.xlu0 %v1474_v5  ;;  %v1385_v57 = vpop.f32.mrf.mxu3  ;;  %v1367_v27 = vpop.f32.mrf.mxu1 }
 0x2dc   : > { %v1475_v12 = vmul.f32 %v3660_v32, %v3660_v32  ;;  %v1433_v14 = vsel %vm1401_vm7, %v1378_v4, %v1417_v30 }
 0x2dd   : > { %vm1394_vm8 = vcmp.ge.f32.partialorder %v1361_v56, 0.0  ;;  %v1410_v17 = vmul.f32 0.2, %v1361_v56  ;;  %v1331_v11 = vpop.f32.mrf.mxu2  ;;  %v1450_v54 = vmul.f32 %v3610_v39, %v1433_v14 }
 0x2de   : > { %1494 = vadd.xlane.f32.xlu2 %v1475_v12  ;;  %v1332_v49 = vadd.f32 %v1331_v11, %v3607_v55 }
 0x2df   : > { %v1426_v58 = vsel %vm1394_vm8, %v1361_v56, %v1410_v17  ;;  %v3667_v46 = vadd.f32 %v3613_v45, %v1450_v54 }
 0x2e0   : > { %v1381_v22 = vadd.f32 %v1380_v37, %v1332_v49  ;;  %v1313_v25 = vpop.f32.mrf.mxu0  ;;  %v1443_v43 = vmul.f32 %v3610_v39, %v1426_v58 }
 0x2e1   : > { %v1314_v47 = vadd.f32 %v1313_v25, %v3607_v55  ;;  %v1483_v42 = vmul.f32 %v3667_v46, %v3667_v46 }
 0x2e2   : > { %vm1402_vm9 = vcmp.ge.f32.partialorder %v1381_v22, 0.0  ;;  %v1418_v33 = vmul.f32 0.2, %v1381_v22  ;;  %v3672_v35 = vadd.f32 %v3613_v45, %v1443_v43 }
 0x2e3   : > { %v1363_v62 = vadd.f32 %v1362_v48, %v1314_v47  ;;  %v1387_v54 = vpop.f32.mrf.mxu3 }
 0x2e4   : > { %v1476_v13 = vmul.f32 %v3672_v35, %v3672_v35  ;;  %v1434_v3 = vsel %vm1402_vm9, %v1381_v22, %v1418_v33 }
 0x2e5   : > { %vm1395_vm10 = vcmp.ge.f32.partialorder %v1363_v62, 0.0  ;;  %v1411_v2 = vmul.f32 0.2, %v1363_v62  ;;  %v1333_v28 = vpop.f32.mrf.mxu2  ;;  %v1451_v60 = vmul.f32 %v3610_v39, %v1434_v3 }
 0x2e6   : > { %1510 = vadd.xlane.f32.xlu2 %v1483_v42  ;;  %v1334_v15 = vadd.f32 %v1333_v28, %v3607_v55  ;;  %1496 = vadd.xlane.f32.xlu1 %v1476_v13 }
 0x2e7   : > { %v3681_v16 = vadd.f32 %v3613_v45, %v1451_v60  ;;  %v1427_v21 = vsel %vm1395_vm10, %v1363_v62, %v1411_v2 }
 0x2e8   : > { %v1383_v20 = vadd.f32 %v1382_v51, %v1334_v15  ;;  %v1316_v26 = vpop.f32.mrf.mxu0  ;;  %v1444_v10 = vmul.f32 %v3610_v39, %v1427_v21 }
 0x2e9   : > { %v1317_v44 = vadd.f32 %v1316_v26, %v3607_v55  ;;  %v1484_v8 = vmul.f32 %v3681_v16, %v3681_v16 }
 0x2ea   : > { %vm1403_vm11 = vcmp.ge.f32.partialorder %v1383_v20, 0.0  ;;  %v1419_v9 = vmul.f32 0.2, %v1383_v20  ;;  %v3688_v63 = vadd.f32 %v3613_v45, %v1444_v10 }
 0x2eb   : > { %v1366_v23 = vadd.f32 %v1365_v38, %v1317_v44  ;;  %1512 = vadd.xlane.f32.xlu0 %v1484_v8 }
 0x2ec   : > { %v1477_v61 = vmul.f32 %v3688_v63, %v3688_v63  ;;  %v1435_v24 = vsel %vm1403_vm11, %v1383_v20, %v1419_v9 }
 0x2ed   : > { %vm1396_vm12 = vcmp.ge.f32.partialorder %v1366_v23, 0.0  ;;  %v1412_v34 = vmul.f32 0.2, %v1366_v23  ;;  %v1336_v6 = vpop.f32.mrf.mxu2  ;;  %v1452_v7 = vmul.f32 %v3610_v39, %v1435_v24 }
 0x2ee   : > { %v1337_v50 = vadd.f32 %v1336_v6, %v3607_v55  ;;  %1498 = vadd.xlane.f32.xlu2 %v1477_v61 }
 0x2ef   : > { %v1428_v19 = vsel %vm1396_vm12, %v1366_v23, %v1412_v34  ;;  %v3695_v53 = vadd.f32 %v3613_v45, %v1452_v7 }
 0x2f0   : > { %v1386_v31 = vadd.f32 %v1385_v57, %v1337_v50  ;;  %v1318_v4 = vpop.f32.mrf.mxu0  ;;  %v1445_v36 = vmul.f32 %v3610_v39, %v1428_v19 }
 0x2f1   : > { %v1319_v0 = vadd.f32 %v1318_v4, %v3607_v55  ;;  %v1485_v13 = vmul.f32 %v3695_v53, %v3695_v53 }
 0x2f2   : > { %vm1404_vm13 = vcmp.ge.f32.partialorder %v1386_v31, 0.0  ;;  %v1420_v37 = vmul.f32 0.2, %v1386_v31  ;;  %v3700_v1 = vadd.f32 %v3613_v45, %v1445_v36 }
 0x2f3   : > { %v1368_v5 = vadd.f32 %v1367_v27, %v1319_v0 }
 0x2f4   : > { %v1478_v30 = vmul.f32 %v3700_v1, %v3700_v1  ;;  %v1436_v56 = vsel %vm1404_vm13, %v1386_v31, %v1420_v37 }
 0x2f5   : > { %vm1397_vm14 = vcmp.ge.f32.partialorder %v1368_v5, 0.0  ;;  %v1413_v12 = vmul.f32 0.2, %v1368_v5  ;;  %v1338_v14 = vpop.f32.mrf.mxu2  ;;  %v1453_v17 = vmul.f32 %v3610_v39, %v1436_v56 }
 0x2f6   : > { %v1339_v11 = vadd.f32 %v1338_v14, %v3607_v55  ;;  %1500 = vadd.xlane.f32.xlu0 %v1478_v30 }
 0x2f7   : > { %v3707_v48 = vadd.f32 %v3613_v45, %v1453_v17  ;;  %v1429_v49 = vsel %vm1397_vm14, %v1368_v5, %v1413_v12 }
 0x2f8   : > { %v1388_v58 = vadd.f32 %v1387_v54, %v1339_v11  ;;  %v1446_v22 = vmul.f32 %v3610_v39, %v1429_v49 }
 0x2f9   : > { %v1486_v25 = vmul.f32 %v3707_v48, %v3707_v48 }
 0x2fa   : > { %vm1405_vm15 = vcmp.ge.f32.partialorder %v1388_v58, 0.0  ;;  %v1421_v43 = vmul.f32 0.2, %v1388_v58  ;;  %v3713_v47 = vadd.f32 %v3613_v45, %v1446_v22 }
 0x2fb   : > { %1516 = vadd.xlane.f32.xlu2 %v1486_v25 }
 0x2fc   : > { %v1479_v55 = vmul.f32 %v3713_v47, %v3713_v47  ;;  %v1437_v33 = vsel %vm1405_vm15, %v1388_v58, %v1421_v43 }
 0x2fd   : > { %v1454_v62 = vmul.f32 %v3610_v39, %v1437_v33 }
 0x2fe   : > { %1502 = vadd.xlane.f32.xlu1 %v1479_v55 }
 0x2ff   : > { %v3719_v51 = vadd.f32 %v3613_v45, %v1454_v62 }
 0x301   : > { %v1487_v42 = vmul.f32 %v3719_v51, %v3719_v51 }
 0x303   : > { %1518 = vadd.xlane.f32.xlu0 %v1487_v42 }
 0x306   : > { %1514 = vadd.xlane.f32.xlu1 %v1485_v13 }
 0x339   : > { %v1489_v3 = vpop.xlane.xlu2 %1488 }
 0x33a   : > { %v1520_v2 = vmax.f32 %v1489_v3, 1e-24 }
 0x33c   : > { %2426 = vrsqrt.f32 %v1520_v2  ;;  %vm1542_vm1 = vweird.f32 %v1520_v2 }
 0x341   : > { %v1505_v28 = vpop.xlane.xlu2 %1504  ;;  %v1491_v60 = vpop.xlane.xlu1 %1490 }
 0x342   : > { %v2427_v15 = vpop.eup %2426  ;;  %v1528_v21 = vmax.f32 %v1505_v28, 1e-24  ;;  %v1521_v39 = vmax.f32 %v1491_v60, 1e-24 }
 0x343   : > { %v1537_v38 = vmul.f32 %v2427_v15, %v1520_v2  ;;  %vm1543_vm0 = vweird.f32 %v2427_v15 }
 0x344   : > { %2428 = vrsqrt.f32 %v1528_v21  ;;  %vm1544_vm2 = vmor %vm1542_vm1, %vm1543_vm0  ;;  %vm1622_vm5 = vweird.f32 %v1528_v21  ;;  %vm1552_vm7 = vweird.f32 %v1521_v39 }
 0x345   : > { %v1538_v45 = vmul.f32 %v2427_v15, %v1537_v38  ;;  %2430 = vrsqrt.f32 %v1521_v39 }
 0x346   : > { %v1507_v20 = vpop.xlane.xlu0 %1506 }
 0x347   : > { %v1539_v26 = vmul.f32 0.5, %v1538_v45  ;;  %v1529_v10 = vmax.f32 %v1507_v20, 1e-24 }
 0x349   : > { %v1540_v44 = vsub.f32 1.5, %v1539_v26  ;;  %2432 = vrsqrt.f32 %v1529_v10  ;;  %vm1632_vm10 = vweird.f32 %v1529_v10 }
 0x34a   : > { %v2429_v8 = vpop.eup %2428 }
 0x34b   : > { %v2431_v9 = vpop.eup %2430  ;;  %v1541_v23 = vmul.f32 %v2427_v15, %v1540_v44  ;;  %v1617_v61 = vmul.f32 %v2429_v8, %v1528_v21  ;;  %vm1623_vm3 = vweird.f32 %v2429_v8 }
 0x34c   : > { %v1547_v24 = vmul.f32 %v2431_v9, %v1521_v39  ;;  %vm1553_vm4 = vweird.f32 %v2431_v9  ;;  %vm1624_vm6 = vmor %vm1622_vm5, %vm1623_vm3 }
 0x34d   : > { %v1545_v34 = vsel %vm1544_vm2, %v2427_v15, %v1541_v23  ;;  %v1618_v57 = vmul.f32 %v2429_v8, %v1617_v61  ;;  %vm1554_vm8 = vmor %vm1552_vm7, %vm1553_vm4 }
 0x34e   : > { %v1696_v6 = vmul.f32 %v1545_v34, %v3618_v18  ;;  %v1548_v7 = vmul.f32 %v2431_v9, %v1547_v24  ;;  %v1493_v50 = vpop.xlane.xlu0 %1492  ;;  %v1509_v19 = vpop.xlane.xlu1 %1508 }
 0x34f   : > { %v2433_v31 = vpop.eup %2432  ;;  %v1619_v4 = vmul.f32 0.5, %v1618_v57  ;;  %v3726_v36 = vmax.f32 %v1493_v50, 1e-24  ;;  %v3728_v0 = vmax.f32 %v1509_v19, 1e-24 }
 0x350   : > { %1712 = vst [vmem:[%s2899_s3] sm:$0xff] %v1696_v6  ;;  %v1549_v27 = vmul.f32 0.5, %v1548_v7  ;;  %v1627_v37 = vmul.f32 %v2433_v31, %v1529_v10  ;;  %vm1633_vm9 = vweird.f32 %v2433_v31 }
 0x351   : > { %v1620_v5 = vsub.f32 1.5, %v1619_v4  ;;  %2434 = vrsqrt.f32 %v3726_v36  ;;  %v1495_v30 = vpop.xlane.xlu2 %1494  ;;  %vm1634_vm11 = vmor %vm1632_vm10, %vm1633_vm9  ;;  %vm1562_vm14 = vweird.f32 %v3726_v36  ;;  %vm1642_vm15 = vweird.f32 %v3728_v0 }
 0x352   : > { %v1550_v56 = vsub.f32 1.5, %v1549_v27  ;;  %v1628_v18 = vmul.f32 %v2433_v31, %v1627_v37  ;;  %2436 = vrsqrt.f32 %v3728_v0  ;;  %v3733_v12 = vmax.f32 %v1495_v30, 1e-24 }
 0x353   : > { %v1621_v14 = vmul.f32 %v2429_v8, %v1620_v5 }
 0x354   : > { %v1551_v17 = vmul.f32 %v2431_v9, %v1550_v56  ;;  %v1629_v11 = vmul.f32 0.5, %v1628_v18  ;;  %2438 = vrsqrt.f32 %v3733_v12  ;;  %vm1572_vm3 = vweird.f32 %v3733_v12 }
 0x355   : > { %v1625_v54 = vsel %vm1624_vm6, %v2429_v8, %v1621_v14 }
 0x356   : > { %v1704_v49 = vmul.f32 %v1625_v54, %v3626_v59  ;;  %v1555_v58 = vsel %vm1554_vm8, %v2431_v9, %v1551_v17  ;;  %v1630_v22 = vsub.f32 1.5, %v1629_v11 }
 0x357   : > { %v2435_v25 = vpop.eup %2434  ;;  %v1697_v43 = vmul.f32 %v1555_v58, %v3630_v40 }
 0x358   : > { %v2437_v55 = vpop.eup %2436  ;;  %1720 = vst [vmem:[%s2899_s3 + $0x40] sm:$0xff] %v1704_v49  ;;  %v1631_v33 = vmul.f32 %v2433_v31, %v1630_v22  ;;  %v1557_v62 = vmul.f32 %v2435_v25, %v3726_v36  ;;  %vm1563_vm12 = vweird.f32 %v2435_v25 }
 0x359   : > { %1713 = vst [vmem:[%s2899_s3 + $0x8] sm:$0xff] %v1697_v43  ;;  %v2153_v42 = vpack.c.bf16 %v1697_v43, %v1696_v6  ;;  %v1637_v13 = vmul.f32 %v2437_v55, %v3728_v0  ;;  %v1511_v59 = vpop.xlane.xlu2 %1510  ;;  %v1497_v3 = vpop.xlane.xlu1 %1496  ;;  %vm1643_vm13 = vweird.f32 %v2437_v55  ;;  %vm1564_vm0 = vmor %vm1562_vm14, %vm1563_vm12 }
 0x35a   : > { %v2439_v2 = vpop.eup %2438  ;;  %v1635_v28 = vsel %vm1634_vm11, %v2433_v31, %v1631_v33  ;;  %v1558_v60 = vmul.f32 %v2435_v25, %v1557_v62  ;;  %v3743_v15 = vmax.f32 %v1511_v59, 1e-24  ;;  %v3745_v40 = vmax.f32 %v1497_v3, 1e-24  ;;  %vm1644_vm2 = vmor %vm1642_vm15, %vm1643_vm13 }
 0x35b   : > { %2154 = vst [vmem:[%s2901_s13] sm:$0xff] %v2153_v42   ;;  %v1705_v21 = vmul.f32 %v1635_v28, %v3639_v41  ;;  %v1638_v39 = vmul.f32 %v2437_v55, %v1637_v13  ;;  %v1567_v38 = vmul.f32 %v2439_v2, %v3733_v12  ;;  %vm1573_vm1 = vweird.f32 %v2439_v2 }
 0x35c   : > { %v1559_v45 = vmul.f32 0.5, %v1558_v60  ;;  %2440 = vrsqrt.f32 %v3743_v15  ;;  %vm1574_vm4 = vmor %vm1572_vm3, %vm1573_vm1  ;;  %vm1652_vm7 = vweird.f32 %v3743_v15  ;;  %vm1582_vm9 = vweird.f32 %v3745_v40 }
 0x35d   : > { %1721 = vst [vmem:[%s2899_s3 + $0x48] sm:$0xff] %v1705_v21  ;;  %v2173_v20 = vpack.c.bf16 %v1705_v21, %v1704_v49  ;;  %v1639_v26 = vmul.f32 0.5, %v1638_v39  ;;  %v1568_v10 = vmul.f32 %v2439_v2, %v1567_v38  ;;  %2442 = vrsqrt.f32 %v3745_v40 }
 0x35e   : > { %v1560_v44 = vsub.f32 1.5, %v1559_v45  ;;  %v1513_v8 = vpop.xlane.xlu0 %1512 }
 0x35f   : > { %2193 = vst [vmem:[%s2901_s13 + $0x20] sm:$0xff] %v2173_v20   ;;  %v1640_v9 = vsub.f32 1.5, %v1639_v26  ;;  %v1569_v23 = vmul.f32 0.5, %v1568_v10  ;;  %v3754_v41 = vmax.f32 %v1513_v8, 1e-24 }
 0x360   : > { %v1561_v61 = vmul.f32 %v2435_v25, %v1560_v44 }
 0x361   : > { %v1641_v24 = vmul.f32 %v2437_v55, %v1640_v9  ;;  %v1570_v34 = vsub.f32 1.5, %v1569_v23  ;;  %2444 = vrsqrt.f32 %v3754_v41  ;;  %v1499_v57 = vpop.xlane.xlu2 %1498  ;;  %vm1662_vm12 = vweird.f32 %v3754_v41 }
 0x362   : > { %v2441_v6 = vpop.eup %2440  ;;  %v1565_v7 = vsel %vm1564_vm0, %v2435_v25, %v1561_v61  ;;  %v3760_v50 = vmax.f32 %v1499_v57, 1e-24 }
 0x363   : > { %v2443_v19 = vpop.eup %2442  ;;  %v1698_v31 = vmul.f32 %v1565_v7, %v3647_v29  ;;  %v1645_v4 = vsel %vm1644_vm2, %v2437_v55, %v1641_v24  ;;  %v1571_v36 = vmul.f32 %v2439_v2, %v1570_v34  ;;  %v1647_v0 = vmul.f32 %v2441_v6, %v3743_v15 }
 0x364   : > { %v1706_v27 = vmul.f32 %v1645_v4, %v3651_v52  ;;  %v1577_v37 = vmul.f32 %v2443_v19, %v3745_v40  ;;  %2446 = vrsqrt.f32 %v3760_v50  ;;  %vm1653_vm5 = vweird.f32 %v2441_v6 }
 0x365   : > { %1714 = vst [vmem:[%s2899_s3 + $0x10] sm:$0xff] %v1698_v31  ;;  %v1575_v5 = vsel %vm1574_vm4, %v2439_v2, %v1571_v36  ;;  %v1648_v30 = vmul.f32 %v2441_v6, %v1647_v0  ;;  %vm1583_vm6 = vweird.f32 %v2443_v19  ;;  %vm1654_vm8 = vmor %vm1652_vm7, %vm1653_vm5  ;;  %vm1592_vm15 = vweird.f32 %v3760_v50 }
 0x366   : > { %1722 = vst [vmem:[%s2899_s3 + $0x50] sm:$0xff] %v1706_v27  ;;  %v1699_v56 = vmul.f32 %v1575_v5, %v3660_v32  ;;  %v1578_v29 = vmul.f32 %v2443_v19, %v1577_v37  ;;  %vm1584_vm10 = vmor %vm1582_vm9, %vm1583_vm6 }
 0x367   : > { %v2445_v18 = vpop.eup %2444  ;;  %v1649_v12 = vmul.f32 0.5, %v1648_v30 }
 0x368   : > { %1715 = vst [vmem:[%s2899_s3 + $0x18] sm:$0xff] %v1699_v56  ;;  %v2158_v14 = vpack.c.bf16 %v1699_v56, %v1698_v31  ;;  %v1579_v17 = vmul.f32 0.5, %v1578_v29  ;;  %v1657_v52 = vmul.f32 %v2445_v18, %v3754_v41  ;;  %vm1663_vm11 = vweird.f32 %v2445_v18 }
 0x369   : > { %v1650_v11 = vsub.f32 1.5, %v1649_v12  ;;  %v1501_v54 = vpop.xlane.xlu0 %1500  ;;  %vm1664_vm13 = vmor %vm1662_vm12, %vm1663_vm11 }
 0x36a   : > { %2190 = vst [vmem:[%s2901_s13 + $0x8] sm:$0xff] %v2158_v14   ;;  %v1580_v49 = vsub.f32 1.5, %v1579_v17  ;;  %v1658_v58 = vmul.f32 %v2445_v18, %v1657_v52  ;;  %v3773_v22 = vmax.f32 %v1501_v54, 1e-24  ;;  %v2447_v25 = vpop.eup %2446 }
 0x36b   : > { %v1651_v43 = vmul.f32 %v2441_v6, %v1650_v11  ;;  %v1587_v33 = vmul.f32 %v2447_v25, %v3760_v50  ;;  %vm1593_vm14 = vweird.f32 %v2447_v25 }
 0x36c   : > { %v1581_v32 = vmul.f32 %v2443_v19, %v1580_v49  ;;  %v1659_v55 = vmul.f32 0.5, %v1658_v58  ;;  %2448 = vrsqrt.f32 %v3773_v22  ;;  %vm1594_vm0 = vmor %vm1592_vm15, %vm1593_vm14  ;;  %vm1602_vm2 = vweird.f32 %v3773_v22 }
 0x36d   : > { %v1655_v62 = vsel %vm1654_vm8, %v2441_v6, %v1651_v43  ;;  %v1588_v3 = vmul.f32 %v2447_v25, %v1587_v33 }
 0x36e   : > { %v1707_v42 = vmul.f32 %v1655_v62, %v3667_v46  ;;  %v1585_v13 = vsel %vm1584_vm10, %v2443_v19, %v1581_v32  ;;  %v1660_v59 = vsub.f32 1.5, %v1659_v55  ;;  %v1517_v2 = vpop.xlane.xlu2 %1516 }
 0x36f   : > { %v1700_v28 = vmul.f32 %v1585_v13, %v3672_v35  ;;  %v1534_v60 = vmax.f32 %v1517_v2, 1e-24  ;;  %v1589_v21 = vmul.f32 0.5, %v1588_v3 }
 0x370   : > { %1723 = vst [vmem:[%s2899_s3 + $0x58] sm:$0xff] %v1707_v42  ;;  %v2178_v15 = vpack.c.bf16 %v1707_v42, %v1706_v27  ;;  %v1661_v40 = vmul.f32 %v2445_v18, %v1660_v59 }
 0x371   : > { %1716 = vst [vmem:[%s2899_s3 + $0x20] sm:$0xff] %v1700_v28  ;;  %2450 = vrsqrt.f32 %v1534_v60  ;;  %v1503_v46 = vpop.xlane.xlu1 %1502  ;;  %v1590_v38 = vsub.f32 1.5, %v1589_v21  ;;  %vm1682_vm5 = vweird.f32 %v1534_v60 }
 0x372   : > { %2194 = vst [vmem:[%s2901_s13 + $0x28] sm:$0xff] %v2178_v15   ;;  %v1665_v39 = vsel %vm1664_vm13, %v2445_v18, %v1661_v40  ;;  %v1527_v45 = vmax.f32 %v1503_v46, 1e-24  ;;  %v2449_v20 = vpop.eup %2448 }
 0x373   : > { %v3787_v35 = vmul.f32 %v1665_v39, %v3681_v16  ;;  %v1591_v26 = vmul.f32 %v2447_v25, %v1590_v38  ;;  %v1597_v10 = vmul.f32 %v2449_v20, %v3773_v22  ;;  %vm1603_vm1 = vweird.f32 %v2449_v20 }
 0x374   : > { %2452 = vrsqrt.f32 %v1527_v45  ;;  %vm1604_vm3 = vmor %vm1602_vm2, %vm1603_vm1  ;;  %vm1612_vm8 = vweird.f32 %v1527_v45 }
 0x375   : > { %1724 = vst [vmem:[%s2899_s3 + $0x60] sm:$0xff] %v3787_v35  ;;  %v1595_v44 = vsel %vm1594_vm0, %v2447_v25, %v1591_v26  ;;  %v1598_v8 = vmul.f32 %v2449_v20, %v1597_v10 }
 0x376   : > { %v1519_v9 = vpop.xlane.xlu0 %1518  ;;  %v1701_v41 = vmul.f32 %v1595_v44, %v3688_v63 }
 0x377   : > { %v2451_v23 = vpop.eup %2450  ;;  %v1535_v61 = vmax.f32 %v1519_v9, 1e-24  ;;  %v1599_v24 = vmul.f32 0.5, %v1598_v8 }
 0x378   : > { %v1677_v16 = vmul.f32 %v2451_v23, %v1534_v60  ;;  %1717 = vst [vmem:[%s2899_s3 + $0x28] sm:$0xff] %v1701_v41  ;;  %v2163_v34 = vpack.c.bf16 %v1701_v41, %v1700_v28  ;;  %vm1683_vm4 = vweird.f32 %v2451_v23 }
 0x379   : > { %2454 = vrsqrt.f32 %v1535_v61  ;;  %v1515_v57 = vpop.xlane.xlu1 %1514  ;;  %v1600_v7 = vsub.f32 1.5, %v1599_v24  ;;  %vm1684_vm6 = vmor %vm1682_vm5, %vm1683_vm4  ;;  %vm1692_vm11 = vweird.f32 %v1535_v61 }
 0x37a   : > { %v2453_v6 = vpop.eup %2452  ;;  %v1678_v50 = vmul.f32 %v2451_v23, %v1677_v16  ;;  %v1533_v19 = vmax.f32 %v1515_v57, 1e-24  ;;  %2191 = vst [vmem:[%s2901_s13 + $0x10] sm:$0xff] %v2163_v34  }
 0x37b   : > { %v1607_v31 = vmul.f32 %v2453_v6, %v1527_v45  ;;  %v1601_v4 = vmul.f32 %v2449_v20, %v1600_v7  ;;  %vm1613_vm7 = vweird.f32 %v2453_v6 }
 0x37c   : > { %v1679_v36 = vmul.f32 0.5, %v1678_v50  ;;  %2456 = vrsqrt.f32 %v1533_v19  ;;  %vm1614_vm9 = vmor %vm1612_vm8, %vm1613_vm7  ;;  %vm1672_vm14 = vweird.f32 %v1533_v19 }
 0x37d   : > { %v1608_v63 = vmul.f32 %v2453_v6, %v1607_v31  ;;  %v1605_v0 = vsel %vm1604_vm3, %v2449_v20, %v1601_v4 }
 0x37e   : > { %v1680_v27 = vsub.f32 1.5, %v1679_v36  ;;  %v1702_v5 = vmul.f32 %v1605_v0, %v3700_v1 }
 0x37f   : > { %v2455_v37 = vpop.eup %2454  ;;  %v1609_v30 = vmul.f32 0.5, %v1608_v63 }
 0x380   : > { %v1681_v56 = vmul.f32 %v2451_v23, %v1680_v27  ;;  %v1687_v29 = vmul.f32 %v2455_v37, %v1535_v61  ;;  %1718 = vst [vmem:[%s2899_s3 + $0x30] sm:$0xff] %v1702_v5  ;;  %vm1693_vm10 = vweird.f32 %v2455_v37 }
 0x381   : > { %v1610_v18 = vsub.f32 1.5, %v1609_v30  ;;  %vm1694_vm12 = vmor %vm1692_vm11, %vm1693_vm10 }
 0x382   : > { %v2457_v12 = vpop.eup %2456  ;;  %v1685_v14 = vsel %vm1684_vm6, %v2451_v23, %v1681_v56  ;;  %v1688_v17 = vmul.f32 %v2455_v37, %v1687_v29 }
 0x383   : > { %v1710_v52 = vmul.f32 %v1685_v14, %v3707_v48  ;;  %v1611_v11 = vmul.f32 %v2453_v6, %v1610_v18  ;;  %v1667_v54 = vmul.f32 %v2457_v12, %v1533_v19  ;;  %vm1673_vm13 = vweird.f32 %v2457_v12 }
 0x384   : > { %v1689_v1 = vmul.f32 0.5, %v1688_v17  ;;  %vm1674_vm15 = vmor %vm1672_vm14, %vm1673_vm13 }
 0x385   : > { %1726 = vst [vmem:[%s2899_s3 + $0x70] sm:$0xff] %v1710_v52  ;;  %v1615_v49 = vsel %vm1614_vm9, %v2453_v6, %v1611_v11  ;;  %v1668_v58 = vmul.f32 %v2457_v12, %v1667_v54 }
 0x386   : > { %v1703_v22 = vmul.f32 %v1615_v49, %v3713_v47  ;;  %v1690_v25 = vsub.f32 1.5, %v1689_v1 }
 0x387   : > { %v1669_v43 = vmul.f32 0.5, %v1668_v58 }
 0x388   : > { %1719 = vst [vmem:[%s2899_s3 + $0x38] sm:$0xff] %v1703_v22  ;;  %v2168_v32 = vpack.c.bf16 %v1703_v22, %v1702_v5  ;;  %v1691_v55 = vmul.f32 %v2455_v37, %v1690_v25 }
 0x389   : > { %v1670_v48 = vsub.f32 1.5, %v1669_v43 }
 0x38a   : > { %2192 = vst [vmem:[%s2901_s13 + $0x18] sm:$0xff] %v2168_v32   ;;  %v1695_v33 = vsel %vm1694_vm12, %v2455_v37, %v1691_v55 }
 0x38b   : > { %v1711_v62 = vmul.f32 %v1695_v33, %v3719_v51  ;;  %v1671_v42 = vmul.f32 %v2457_v12, %v1670_v48 }
 0x38d   : > { %1727 = vst [vmem:[%s2899_s3 + $0x78] sm:$0xff] %v1711_v62  ;;  %v2188_v47 = vpack.c.bf16 %v1711_v62, %v1710_v52  ;;  %v1675_v13 = vsel %vm1674_vm15, %v2457_v12, %v1671_v42 }
 0x38e   : > { %v1709_v59 = vmul.f32 %v1675_v13, %v3695_v53 }
 0x38f   : > { %2196 = vst [vmem:[%s2901_s13 + $0x38] sm:$0xff] %v2188_v47  }
 0x390   : > { %1725 = vst [vmem:[%s2899_s3 + $0x68] sm:$0xff] %v1709_v59  ;;  %v2183_v3 = vpack.c.bf16 %v1709_v59, %v3787_v35 }
 0x392   : > { %2195 = vst [vmem:[%s2901_s13 + $0x30] sm:$0xff] %v2183_v3  }
 0x393 PF: > { %s3964_s5 = sld [smem:[#allocation14_spill]]  ;;  %s1778_s15 = sshll.u32 %s2899_s3, 4  ;;  %s1779_s15 = int_to_ptr.vmem [resolvable:$true] %s1778_s15 }
 0x394   : > { %s3965_s28 = sld [smem:[#allocation26_spill]]  ;;  %s1761_s12 = scalar_lea.sflag [#allocation4], %s2888_s6 }
 0x399   : > { %s2148_s8 = sshll.u32 %s3964_s5, 7 }
 0x39a   : > { %s3966_s10 = smov %s3965_s28  ;;  %s1777_s29 = scalar_lea.hbm %s3965_s28, %s2148_s8 }
 0x39b   : > { %s1780_s20 = sshll.u32 %s1777_s29, 4  ;;  %s2547_s1 = scalar_lea.hbm %s3966_s10, 256  ;;  %s1781_s20 = int_to_ptr.hbm [resolvable:$true] %s1780_s20 }
 0x39c   : > { %s2541_s14 = sshra.s32 %s1781_s20, 4  ;;  %s2542_s14 = int_to_ptr.hbm [resolvable:$true] %s2541_s14 }
 0x39d   : > { %s2543_s9 = scalar_lea.hbm %s2542_s14, 128  ;;  %p2548_p1 = scmp.lt.s32.totalorder %s2542_s14, %s3966_s10 }
 0x39e   : > { %p2544_p12 = scmp.ne.s32.totalorder %s2542_s14, %s2543_s9  ;;  %p2549_p3 = scmp.lt.s32.totalorder %s2547_s1, %s2543_s9 }
 0x3a0   : > { %p2545_p13 = pnand %p2544_p12, %p2859_p7  ;;  %p2550_p4 = por %p2549_p3, %p2548_p1 }
 0x3a2   : > { %p2546_p0 = pneg %p2545_p13 }
 0x3a4   : > { %p2551_p8 = pnand %p2550_p4, %p2546_p0 }
 0x3a6   : > { %2554 = shalt.err (!%p2551_p8)
}
 0x3a7   : > { %s2693_s3 = smov 128   ;;  %s2694_s8 = smov 8  }
 0x3a8   : > { %2241 = dma.vmem_to_hbm [thread:$0]  (%p2859_p7), %s1779_s15, 2048, %s1781_s20, %s1761_s12, %s2693_s3, %s2693_s3, %s2694_s8  }
 0x3a9   : > { %s2149_s11 = sshll.u32 %s3964_s5, 6  ;;  %s1795_s0 = sshll.u32 %s2901_s13, 4  ;;  %s1796_s0 = int_to_ptr.vmem [resolvable:$true] %s1795_s0 }
 0x3aa   : > { %s3967_s29 = sld [smem:[#allocation27_spill]]  ;;  %s1766_s4 = scalar_lea.sflag [#allocation9], %s2888_s6 }
 0x3b0   : > { %s3968_s16 = smov %s3967_s29  ;;  %s1794_s2 = scalar_lea.hbm %s3967_s29, %s2149_s11 }
 0x3b1   : > { %s1797_s1 = sshll.u32 %s1794_s2, 4  ;;  %s2575_s5 = scalar_lea.hbm %s3968_s16, 128  ;;  %s1798_s1 = int_to_ptr.hbm [resolvable:$true] %s1797_s1 }
 0x3b2   : > { %s2569_s14 = sshra.s32 %s1798_s1, 4  ;;  %s2570_s14 = int_to_ptr.hbm [resolvable:$true] %s2569_s14 }
 0x3b3   : > { %s2571_s9 = scalar_lea.hbm %s2570_s14, 64  ;;  %p2576_p6 = scmp.lt.s32.totalorder %s2570_s14, %s3968_s16 }
 0x3b4   : > { %p2572_p9 = scmp.ne.s32.totalorder %s2570_s14, %s2571_s9  ;;  %p2577_p11 = scmp.lt.s32.totalorder %s2575_s5, %s2571_s9 }
 0x3b6   : > { %p2573_p10 = pnand %p2572_p9, %p2859_p7  ;;  %p2578_p12 = por %p2577_p11, %p2576_p6 }
 0x3b8   : > { %p2574_p2 = pneg %p2573_p10 }
 0x3ba   : > { %p2579_p13 = pnand %p2578_p12, %p2574_p2 }
 0x3bc   : > { %2582 = shalt.err (!%p2579_p13)
}
 0x3bd   : > { %s2695_s6 = smov 64   ;;  %s2696_s20 = smov 4  }
 0x3be   : > { %2242 = dma.vmem_to_hbm [thread:$0]  (%p2859_p7), %s1796_s0, 1024, %s1798_s1, %s1766_s4, %s2695_s6, %s2695_s6, %s2696_s20  }
 0x3bf PF: > { %p2260_p0 = scmp.ge.s32.totalorder %s2685_s7, 2  ;;  %s1812_s30 = sand.u32 1, %s2645_s21  }
 0x3c0   : > { %s1813_s10 = scalar_lea.sflag [#allocation4], %s1812_s30 }
 0x3c1   : > { %p2253_p1 = pnand %p2260_p0, %p2863_p5 }
 0x3c3   : > { %p2254_p3 = pneg %p2253_p1 }
 0x3c5   : > { %2636 = dma.done.wait (%p2254_p3), %s1813_s10, 2048  }
 0x3c6   : > { %2638 = vsyncadd (%p2254_p3), %s1813_s10, 4294965248  ;;  %s1823_s12 = scalar_lea.sflag [#allocation9], %s1812_s30 }
 0x3c7   : > { %2640 = dma.done.wait (%p2254_p3), %s1823_s12, 1024  }
 0x3c8   : > { %2642 = vsyncadd (%p2254_p3), %s1823_s12, 4294966272  ;;  %s29_s7 = sadd.s32 1, %s2685_s7   ;;  %s3969_s27 = sld [smem:[#allocation15_spill]] }
 0x3c9   : > { %p26_p4 = scmp.ge.s32.totalorder %s29_s7, 6   ;;  %s3970_s28 = sld [smem:[#allocation16_spill]] }
 0x3ca   : > { %s3971_s29 = sld [smem:[#allocation17_spill]]  ;;  %s3973_s21 = smov %s2649_s22 }
 0x3cb   : > { %s3972_s30 = sld [smem:[#allocation18_spill]]  ;;  %s3974_s22 = smov %s2653_s23 }
 0x3cc   : > { %s3975_s23 = smov %s2836_s17  ;;  %s3976_s24 = smov %s2661_s25 }
 0x3cd   : > { %s3977_s25 = smov %s2665_s26  ;;  %s3978_s26 = smov %s2815_s19 }
 0x3ce   :  { %28 = sbr.rel (!%p26_p4) target bundleno = 21 (0x15), region = 124 }
 0x3d3   :  { %1829 = vsyncpa [#allocation3], 1 }
 0x3d4   :  { %1831 = vsyncpa [#allocation3 + $0x1], 1 }
 0x3d5   :  { %1832 = vsyncpa [#allocation6], 1 }
 0x3d6   :  { %1834 = vsyncpa [#allocation6 + $0x1], 1 }
 0x3d7   :  { %1835 = vsyncpa [#allocation4], 1 }
 0x3d8   :  { %1837 = vsyncpa [#allocation4 + $0x1], 1 }
 0x3d9   :  { %1838 = vsyncpa [#allocation9], 1 }
 0x3da   :  { %1840 = vsyncpa [#allocation9 + $0x1], 1 }

</bundles_post_ra>
